<compile_context>
chip_gen: v7x
topology: tpu7x:2x2x1
jax: 0.10.0
libtpu: 0.0.40
codegen_flags: <defaults>
</compile_context>

<pallas_src>
from functools import partial

import jax
import jax.numpy as jnp
from jax.experimental import pallas as pl
from jax.experimental.pallas import tpu as pltpu

LANE, SUB = 128, 8


def _round_up(n, m):
    return (n + m - 1) // m * m


def _gru_decoder_kernel(x_ref,        # (T*Bp, D)    bf16, time-major flattened input
                        wih_ref,      # (D,  3*Hp)   bf16, W_ih^T per-gate 128-lane blocks
                        whh_rz_ref,   # (Hp, 2*Hp)   bf16, W_hh^T r/z gate blocks
                        whh_n_ref,    # (Hp,   Hp)   bf16, W_hh^T n gate block
                        bih_ref,      # (1,  3*Hp)   f32, b_ih with b_hh(r,z) folded in
                        bhhn_ref,     # (1,    Hp)   f32, b_hh n-gate component
                        wc_ref,       # (Hp,   Vp)   bf16, classifier W^T
                        bc_ref,       # (1,    Vp)   f32
                        logits_ref,   # (T*Bp, Vp)   f32 out: time-major flattened logits
                        state_ref,    # (Bp,   Hp)   f32 out: final hidden state
                        gi_scr):      # (T*Bp, 3*Hp) f32 scratch: hoisted input projection
    TB = x_ref.shape[0]
    Hp = whh_n_ref.shape[1]
    Bp = state_ref.shape[0]
    Vp = wc_ref.shape[1]
    T = TB // Bp

    # ---- pre-pass: input projection (+ folded r/z biases) for ALL timesteps ----
    gi_scr[...] = (
        jnp.dot(x_ref[...], wih_ref[...], preferred_element_type=jnp.float32)
        + bih_ref[...]
    )

    # Hoist loop-invariant loads / broadcasts out of the recurrence.
    whh_rz = whh_rz_ref[...]
    whh_n = whh_n_ref[...]
    wc = wc_ref[...]
    bhhn = jnp.broadcast_to(bhhn_ref[...], (Bp, Hp))
    bc = jnp.broadcast_to(bc_ref[...], (Bp, Vp))

    # ---- sequential GRU recurrence (unrolled fori_loop, h lives in vregs) ----
    def step(t, h):
        base = pl.multiple_of(t * Bp, Bp)
        gi = gi_scr[pl.ds(base, Bp), :]                         # (Bp, 3Hp) f32
        h_bf = h.astype(jnp.bfloat16)
        gh_rz = jnp.dot(h_bf, whh_rz, preferred_element_type=jnp.float32)
        gh_n = jnp.dot(h_bf, whh_n, preferred_element_type=jnp.float32)
        # gate slices are 128-lane aligned -> whole-vreg selects, no lane shuffles
        r = jax.nn.sigmoid(gi[:, 0 * Hp:1 * Hp] + gh_rz[:, 0 * Hp:1 * Hp])
        z = jax.nn.sigmoid(gi[:, 1 * Hp:2 * Hp] + gh_rz[:, 1 * Hp:2 * Hp])
        n = jnp.tanh(gi[:, 2 * Hp:3 * Hp] + r * (gh_n + bhhn))
        h_new = (1.0 - z) * n + z * h
        # per-step classifier: full-lane (Bp, Vp) store into the VMEM-resident output
        logits_ref[pl.ds(base, Bp), :] = (
            jnp.dot(h_new.astype(jnp.bfloat16), wc,
                    preferred_element_type=jnp.float32)
            + bc
        )
        return h_new

    h0 = jnp.zeros((Bp, Hp), jnp.float32)
    h_last = jax.lax.fori_loop(0, T, step, h0, unroll=True)
    state_ref[...] = h_last


def pack_rnn_decoder_params(w_ih, w_hh, b_ih, b_hh, w_c, b_c):
    """One-time weight repacking (do at model init, NOT per forward call)."""
    H = w_hh.shape[1]
    D = w_ih.shape[1]
    V = w_c.shape[0]
    Hp = _round_up(H, LANE)           # each gate padded to a full 128-lane block
    Vp = _round_up(V, LANE)           # lane-dense classifier output
    f32, bf16 = jnp.float32, jnp.bfloat16

    def pack_gate_w(w, K):            # (3H, K) torch layout -> (K, 3*Hp) f32
        w3 = jnp.transpose(w.reshape(3, H, K).astype(f32), (0, 2, 1))   # (3, K, H)
        w3 = jnp.pad(w3, ((0, 0), (0, 0), (0, Hp - H)))                 # (3, K, Hp)
        return jnp.transpose(w3, (1, 0, 2)).reshape(K, 3 * Hp)

    def pack_gate_b(b):               # (3H,) -> (1, 3*Hp) f32
        b3 = jnp.pad(b.reshape(3, H).astype(f32), ((0, 0), (0, Hp - H)))
        return b3.reshape(1, 3 * Hp)

    wih_p = pack_gate_w(w_ih, D).astype(bf16)                          # (D, 3Hp)
    whh_full = jnp.pad(pack_gate_w(w_hh, H), ((0, Hp - H), (0, 0)))    # (Hp, 3Hp) f32
    whh_rz = whh_full[:, :2 * Hp].astype(bf16)                         # (Hp, 2Hp)
    whh_n = whh_full[:, 2 * Hp:].astype(bf16)                          # (Hp,  Hp)

    # Fold b_hh's r/z components into the input-side bias (added in the pre-pass);
    # only the n-gate's b_hh must stay inside r*(...) per GRU semantics.
    b_fold = jnp.concatenate(
        [b_ih[:2 * H].astype(f32) + b_hh[:2 * H].astype(f32),
         b_ih[2 * H:].astype(f32)])
    bih_p = pack_gate_b(b_fold)                                        # (1, 3Hp)
    bhhn_p = jnp.pad(b_hh[2 * H:].astype(f32), (0, Hp - H)).reshape(1, Hp)

    wc_p = jnp.pad(jnp.transpose(w_c).astype(f32),
                   ((0, Hp - H), (0, Vp - V))).astype(bf16)            # (Hp, Vp)
    bc_p = jnp.pad(b_c.astype(f32).reshape(1, V), ((0, 0), (0, Vp - V)))

    packed = dict(wih=wih_p, whh_rz=whh_rz, whh_n=whh_n, bih=bih_p,
                  bhhn=bhhn_p, wc=wc_p, bc=bc_p)
    return packed, int(H), int(V)


@partial(jax.jit, static_argnames=("H", "V"))
def rnn_decoder_forward(x, packed, *, H, V):
    """x: (B, T, D) float32. Returns {'logits': (B, T, V), 'states': (1, B, H)}."""
    B, T, D = x.shape
    Hp = packed["whh_n"].shape[0]
    Vp = packed["wc"].shape[1]
    Bp = _round_up(B, SUB)
    f32 = jnp.float32

    # Batch-pad and flatten time-major (row = t*Bp + b); tiny relayout that fuses
    # with the zero-pad + bf16 cast in XLA, keeps every in-kernel access contiguous.
    x_p = jnp.pad(x.astype(f32), ((0, Bp - B), (0, 0), (0, 0)))        # (Bp, T, D)
    x_tm = jnp.transpose(x_p, (1, 0, 2)).reshape(T * Bp, D).astype(jnp.bfloat16)

    # Single invocation (no grid): all operands are tiny and live fully in VMEM.
    logits_tm, state_p = pl.pallas_call(
        _gru_decoder_kernel,
        out_shape=(
            jax.ShapeDtypeStruct((T * Bp, Vp), f32),
            jax.ShapeDtypeStruct((Bp, Hp), f32),
        ),
        scratch_shapes=[
            pltpu.VMEM((T * Bp, 3 * Hp), f32),   # hoisted input projection
        ],
    )(x_tm, packed["wih"], packed["whh_rz"], packed["whh_n"],
      packed["bih"], packed["bhhn"], packed["wc"], packed["bc"])

    # Un-pad / re-order the small outputs (fused slice+transpose on ~32 KiB).
    logits = jnp.transpose(logits_tm.reshape(T, Bp, Vp), (1, 0, 2))[:B, :, :V]
    states = state_p[:B, :H][None]                                     # (1, B, H)
    return {"logits": logits, "states": states}


def _reference_forward_f32(x, w_ih, w_hh, b_ih, b_hh, w_c, b_c):
    """Pure-JAX f32 reference (PyTorch GRU + Linear semantics)."""
    H = w_hh.shape[1]

    def step(h, x_t):
        gi = x_t @ w_ih.T + b_ih
        gh = h @ w_hh.T + b_hh
        r = jax.nn.sigmoid(gi[:, :H] + gh[:, :H])
        z = jax.nn.sigmoid(gi[:, H:2 * H] + gh[:, H:2 * H])
        n = jnp.tanh(gi[:, 2 * H:] + r * gh[:, 2 * H:])
        h_new = (1.0 - z) * n + z * h
        return h_new, h_new

    h0 = jnp.zeros((x.shape[0], H), jnp.float32)
    h_last, outs = jax.lax.scan(step, h0, jnp.transpose(x, (1, 0, 2)))
    out = jnp.transpose(outs, (1, 0, 2))
    return out @ w_c.T + b_c, h_last[None]


def _reference_forward_bf16(x, w_ih, w_hh, b_ih, b_hh, w_c, b_c):
    """Reference with the kernel's numerics: bf16 matmul operands, f32 accum/elementwise."""
    H = w_hh.shape[1]
    bf16 = jnp.bfloat16
    wih_b, whh_b, wc_b = w_ih.T.astype(bf16), w_hh.T.astype(bf16), w_c.T.astype(bf16)

    def step(h, x_t):
        gi = jnp.dot(x_t.astype(bf16), wih_b, preferred_element_type=jnp.float32) + b_ih
        gh = jnp.dot(h.astype(bf16), whh_b, preferred_element_type=jnp.float32) + b_hh
        r = jax.nn.sigmoid(gi[:, :H] + gh[:, :H])
        z = jax.nn.sigmoid(gi[:, H:2 * H] + gh[:, H:2 * H])
        n = jnp.tanh(gi[:, 2 * H:] + r * gh[:, 2 * H:])
        h_new = (1.0 - z) * n + z * h
        logit = jnp.dot(h_new.astype(bf16), wc_b, preferred_element_type=jnp.float32) + b_c
        return h_new, logit

    h0 = jnp.zeros((x.shape[0], H), jnp.float32)
    h_last, logits = jax.lax.scan(step, h0, jnp.transpose(x, (1, 0, 2)))
    return jnp.transpose(logits, (1, 0, 2)), h_last[None]


if __name__ == "__main__":
    # small shapes consistent with the module
    B, T = 2, 8          # batch, sequence length
    D = 16               # input_size
    H = 32               # hidden_size
    V = 40               # vocab_size

    key = jax.random.PRNGKey(0)
    kx, k1, k2, k3, k4, k5, k6 = jax.random.split(key, 7)

    x = jax.random.normal(kx, (B, T, D), jnp.float32)

    # deterministic parameter init (PyTorch-style uniform ranges)
    s = 1.0 / jnp.sqrt(H)
    w_ih = jax.random.uniform(k1, (3 * H, D), jnp.float32, -s, s)
    w_hh = jax.random.uniform(k2, (3 * H, H), jnp.float32, -s, s)
    b_ih = jax.random.uniform(k3, (3 * H,), jnp.float32, -s, s)
    b_hh = jax.random.uniform(k4, (3 * H,), jnp.float32, -s, s)
    # classifier: kaiming_uniform on (V, H) weight, default bias init
    bound_w = jnp.sqrt(6.0 / H)
    w_c = jax.random.uniform(k5, (V, H), jnp.float32, -bound_w, bound_w)
    b_c = jax.random.uniform(k6, (V,), jnp.float32, -s, s)

    # one-time packing (hoisted out of the per-call forward)
    packed, Hs, Vs = pack_rnn_decoder_params(w_ih, w_hh, b_ih, b_hh, w_c, b_c)

    out = rnn_decoder_forward(x, packed, H=Hs, V=Vs)
    jax.block_until_ready(out)

    assert out["logits"].shape == (B, T, V)
    assert out["states"].shape == (1, B, H)

    # tight check against a reference with identical numerics (bf16 operands, f32 accum)
    ref_logits_b, ref_state_b = _reference_forward_bf16(x, w_ih, w_hh, b_ih, b_hh, w_c, b_c)
    assert jnp.allclose(out["logits"], ref_logits_b, atol=3e-3, rtol=3e-3)
    assert jnp.allclose(out["states"], ref_state_b, atol=3e-3, rtol=3e-3)

    # loose check against the pure-f32 PyTorch-semantics reference (bf16 matmul operands)
    ref_logits_f, ref_state_f = _reference_forward_f32(x, w_ih, w_hh, b_ih, b_hh, w_c, b_c)
    assert jnp.allclose(out["logits"], ref_logits_f, atol=1e-1, rtol=1e-1)
    assert jnp.allclose(out["states"], ref_state_f, atol=1e-1, rtol=1e-1)

    print("KERNEL_OK")
</pallas_src>

<mosaic_0001>
module attributes {stable_mosaic.version = 11 : i64} {
  func.func @_gru_decoder_kernel(%arg0: memref<64x16xbf16, #tpu.memory_space<vmem>>, %arg1: memref<16x384xbf16, #tpu.memory_space<vmem>>, %arg2: memref<128x256xbf16, #tpu.memory_space<vmem>>, %arg3: memref<128x128xbf16, #tpu.memory_space<vmem>>, %arg4: memref<1x384xf32, #tpu.memory_space<vmem>>, %arg5: memref<1x128xf32, #tpu.memory_space<vmem>>, %arg6: memref<128x128xbf16, #tpu.memory_space<vmem>>, %arg7: memref<1x128xf32, #tpu.memory_space<vmem>>, %arg8: memref<64x128xf32, #tpu.memory_space<vmem>>, %arg9: memref<8x128xf32, #tpu.memory_space<vmem>>, %arg10: memref<64x384xf32, #tpu.memory_space<vmem>>) attributes {dimension_semantics = [], scalar_prefetch = 0 : i64, scratch_operands = 1 : i64, tpu.core_type = #tpu.core_type<tc>} {
    %c0 = arith.constant 0 : index
    %c0_0 = arith.constant 0 : index
    %0 = vector.load %arg0[%c0, %c0_0] : memref<64x16xbf16, #tpu.memory_space<vmem>>, vector<64x16xbf16>
    %c0_1 = arith.constant 0 : index
    %c0_2 = arith.constant 0 : index
    %1 = vector.load %arg1[%c0_1, %c0_2] : memref<16x384xbf16, #tpu.memory_space<vmem>>, vector<16x384xbf16>
    %cst = arith.constant dense<0.000000e+00> : vector<64x384xf32>
    %2 = tpu.matmul %0, %1, %cst {dimension_numbers = #tpu.dot_dimension_numbers<[1], [0], [0], [1], [0, 0, 1, 1], [], []>} : vector<64x16xbf16>, vector<16x384xbf16>, vector<64x384xf32> -> vector<64x384xf32>
    %c0_3 = arith.constant 0 : index
    %c0_4 = arith.constant 0 : index
    %3 = vector.load %arg4[%c0_3, %c0_4] : memref<1x384xf32, #tpu.memory_space<vmem>>, vector<1x384xf32>
    %4 = vector.broadcast %3 : vector<1x384xf32> to vector<64x384xf32>
    %5 = arith.addf %2, %4 : vector<64x384xf32>
    %c0_5 = arith.constant 0 : index
    %c0_6 = arith.constant 0 : index
    %6 = vector.load %arg10[%c0_5, %c0_6] : memref<64x384xf32, #tpu.memory_space<vmem>>, vector<64x384xf32>
    tpu.vector_store %arg10[%c0_5, %c0_6], %5 {strides = array<i32>} : memref<64x384xf32, #tpu.memory_space<vmem>>, vector<64x384xf32>,
    %c0_7 = arith.constant 0 : index
    %c0_8 = arith.constant 0 : index
    %7 = vector.load %arg2[%c0_7, %c0_8] : memref<128x256xbf16, #tpu.memory_space<vmem>>, vector<128x256xbf16>
    %c0_9 = arith.constant 0 : index
    %c0_10 = arith.constant 0 : index
    %8 = vector.load %arg3[%c0_9, %c0_10] : memref<128x128xbf16, #tpu.memory_space<vmem>>, vector<128x128xbf16>
    %c0_11 = arith.constant 0 : index
    %c0_12 = arith.constant 0 : index
    %9 = vector.load %arg6[%c0_11, %c0_12] : memref<128x128xbf16, #tpu.memory_space<vmem>>, vector<128x128xbf16>
    %c0_13 = arith.constant 0 : index
    %c0_14 = arith.constant 0 : index
    %10 = vector.load %arg5[%c0_13, %c0_14] : memref<1x128xf32, #tpu.memory_space<vmem>>, vector<1x128xf32>
    %11 = vector.shape_cast %10 : vector<1x128xf32> to vector<1x128xf32>
    %12 = vector.broadcast %11 : vector<1x128xf32> to vector<8x128xf32>
    %c0_15 = arith.constant 0 : index
    %c0_16 = arith.constant 0 : index
    %13 = vector.load %arg7[%c0_15, %c0_16] : memref<1x128xf32, #tpu.memory_space<vmem>>, vector<1x128xf32>
    %14 = vector.shape_cast %13 : vector<1x128xf32> to vector<1x128xf32>
    %15 = vector.broadcast %14 : vector<1x128xf32> to vector<8x128xf32>
    %cst_17 = arith.constant 0.000000e+00 : f32
    %16 = vector.broadcast %cst_17 : f32 to vector<8x128xf32>
    %c0_i32 = arith.constant 0 : i32
    %c8_i32 = arith.constant 8 : i32
    %17 = arith.muli %c0_i32, %c8_i32 : i32
    %18 = tpu.assume_multiple %17, 8 : i32
    %19 = arith.index_cast %18 : i32 to index
    %c0_18 = arith.constant 0 : index
    %20 = vector.load %arg10[%19, %c0_18] : memref<64x384xf32, #tpu.memory_space<vmem>>, vector<8x384xf32>
    %21 = arith.truncf %16 : vector<8x128xf32> to vector<8x128xbf16>
    %cst_19 = arith.constant dense<0.000000e+00> : vector<8x256xf32>
    %22 = tpu.matmul %21, %7, %cst_19 {dimension_numbers = #tpu.dot_dimension_numbers<[1], [0], [0], [1], [0, 0, 1, 1], [], []>} : vector<8x128xbf16>, vector<128x256xbf16>, vector<8x256xf32> -> vector<8x256xf32>
    %cst_20 = arith.constant dense<0.000000e+00> : vector<8x128xf32>
    %23 = tpu.matmul %21, %8, %cst_20 {dimension_numbers = #tpu.dot_dimension_numbers<[1], [0], [0], [1], [0, 0, 1, 1], [], []>} : vector<8x128xbf16>, vector<128x128xbf16>, vector<8x128xf32> -> vector<8x128xf32>
    %24 = vector.extract_strided_slice %20 {offsets = [0, 0], sizes = [8, 128], strides = [1, 1]} : vector<8x384xf32> to vector<8x128xf32>
    %25 = vector.extract_strided_slice %22 {offsets = [0, 0], sizes = [8, 128], strides = [1, 1]} : vector<8x256xf32> to vector<8x128xf32>
    %26 = arith.addf %24, %25 : vector<8x128xf32>
    %27 = arith.negf %26 : vector<8x128xf32>
    %28 = math.exp %27 : vector<8x128xf32>
    %cst_21 = arith.constant 1.000000e+00 : f32
    %29 = vector.broadcast %cst_21 : f32 to vector<8x128xf32>
    %30 = arith.addf %29, %28 : vector<8x128xf32>
    %31 = arith.divf %29, %30 : vector<8x128xf32>
    %32 = vector.extract_strided_slice %20 {offsets = [0, 128], sizes = [8, 128], strides = [1, 1]} : vector<8x384xf32> to vector<8x128xf32>
    %33 = vector.extract_strided_slice %22 {offsets = [0, 128], sizes = [8, 128], strides = [1, 1]} : vector<8x256xf32> to vector<8x128xf32>
    %34 = arith.addf %32, %33 : vector<8x128xf32>
    %35 = arith.negf %34 : vector<8x128xf32>
    %36 = math.exp %35 : vector<8x128xf32>
    %cst_22 = arith.constant 1.000000e+00 : f32
    %37 = vector.broadcast %cst_22 : f32 to vector<8x128xf32>
    %38 = arith.addf %37, %36 : vector<8x128xf32>
    %39 = arith.divf %37, %38 : vector<8x128xf32>
    %40 = vector.extract_strided_slice %20 {offsets = [0, 256], sizes = [8, 128], strides = [1, 1]} : vector<8x384xf32> to vector<8x128xf32>
    %41 = arith.addf %23, %12 : vector<8x128xf32>
    %42 = arith.mulf %31, %41 : vector<8x128xf32>
    %43 = arith.addf %40, %42 : vector<8x128xf32>
    %44 = math.tanh %43 : vector<8x128xf32>
    %cst_23 = arith.constant 1.000000e+00 : f32
    %45 = vector.broadcast %cst_23 : f32 to vector<8x128xf32>
    %46 = arith.subf %45, %39 : vector<8x128xf32>
    %47 = arith.mulf %46, %44 : vector<8x128xf32>
    %48 = arith.mulf %39, %16 : vector<8x128xf32>
    %49 = arith.addf %47, %48 : vector<8x128xf32>
    %50 = arith.truncf %49 : vector<8x128xf32> to vector<8x128xbf16>
    %cst_24 = arith.constant dense<0.000000e+00> : vector<8x128xf32>
    %51 = tpu.matmul %50, %9, %cst_24 {dimension_numbers = #tpu.dot_dimension_numbers<[1], [0], [0], [1], [0, 0, 1, 1], [], []>} : vector<8x128xbf16>, vector<128x128xbf16>, vector<8x128xf32> -> vector<8x128xf32>
    %52 = arith.addf %51, %15 : vector<8x128xf32>
    %53 = arith.index_cast %18 : i32 to index
    %c0_25 = arith.constant 0 : index
    %54 = vector.load %arg8[%53, %c0_25] : memref<64x128xf32, #tpu.memory_space<vmem>>, vector<8x128xf32>
    tpu.vector_store %arg8[%53, %c0_25], %52 {strides = array<i32>} : memref<64x128xf32, #tpu.memory_space<vmem>>, vector<8x128xf32>,
    %c1_i32 = arith.constant 1 : i32
    %c8_i32_26 = arith.constant 8 : i32
    %55 = arith.muli %c1_i32, %c8_i32_26 : i32
    %56 = tpu.assume_multiple %55, 8 : i32
    %57 = arith.index_cast %56 : i32 to index
    %c0_27 = arith.constant 0 : index
    %58 = vector.load %arg10[%57, %c0_27] : memref<64x384xf32, #tpu.memory_space<vmem>>, vector<8x384xf32>
    %59 = arith.truncf %49 : vector<8x128xf32> to vector<8x128xbf16>
    %cst_28 = arith.constant dense<0.000000e+00> : vector<8x256xf32>
    %60 = tpu.matmul %59, %7, %cst_28 {dimension_numbers = #tpu.dot_dimension_numbers<[1], [0], [0], [1], [0, 0, 1, 1], [], []>} : vector<8x128xbf16>, vector<128x256xbf16>, vector<8x256xf32> -> vector<8x256xf32>
    %cst_29 = arith.constant dense<0.000000e+00> : vector<8x128xf32>
    %61 = tpu.matmul %59, %8, %cst_29 {dimension_numbers = #tpu.dot_dimension_numbers<[1], [0], [0], [1], [0, 0, 1, 1], [], []>} : vector<8x128xbf16>, vector<128x128xbf16>, vector<8x128xf32> -> vector<8x128xf32>
    %62 = vector.extract_strided_slice %58 {offsets = [0, 0], sizes = [8, 128], strides = [1, 1]} : vector<8x384xf32> to vector<8x128xf32>
    %63 = vector.extract_strided_slice %60 {offsets = [0, 0], sizes = [8, 128], strides = [1, 1]} : vector<8x256xf32> to vector<8x128xf32>
    %64 = arith.addf %62, %63 : vector<8x128xf32>
    %65 = arith.negf %64 : vector<8x128xf32>
    %66 = math.exp %65 : vector<8x128xf32>
    %cst_30 = arith.constant 1.000000e+00 : f32
    %67 = vector.broadcast %cst_30 : f32 to vector<8x128xf32>
    %68 = arith.addf %67, %66 : vector<8x128xf32>
    %69 = arith.divf %67, %68 : vector<8x128xf32>
    %70 = vector.extract_strided_slice %58 {offsets = [0, 128], sizes = [8, 128], strides = [1, 1]} : vector<8x384xf32> to vector<8x128xf32>
    %71 = vector.extract_strided_slice %60 {offsets = [0, 128], sizes = [8, 128], strides = [1, 1]} : vector<8x256xf32> to vector<8x128xf32>
    %72 = arith.addf %70, %71 : vector<8x128xf32>
    %73 = arith.negf %72 : vector<8x128xf32>
    %74 = math.exp %73 : vector<8x128xf32>
    %cst_31 = arith.constant 1.000000e+00 : f32
    %75 = vector.broadcast %cst_31 : f32 to vector<8x128xf32>
    %76 = arith.addf %75, %74 : vector<8x128xf32>
    %77 = arith.divf %75, %76 : vector<8x128xf32>
    %78 = vector.extract_strided_slice %58 {offsets = [0, 256], sizes = [8, 128], strides = [1, 1]} : vector<8x384xf32> to vector<8x128xf32>
    %79 = arith.addf %61, %12 : vector<8x128xf32>
    %80 = arith.mulf %69, %79 : vector<8x128xf32>
    %81 = arith.addf %78, %80 : vector<8x128xf32>
    %82 = math.tanh %81 : vector<8x128xf32>
    %cst_32 = arith.constant 1.000000e+00 : f32
    %83 = vector.broadcast %cst_32 : f32 to vector<8x128xf32>
    %84 = arith.subf %83, %77 : vector<8x128xf32>
    %85 = arith.mulf %84, %82 : vector<8x128xf32>
    %86 = arith.mulf %77, %49 : vector<8x128xf32>
    %87 = arith.addf %85, %86 : vector<8x128xf32>
    %88 = arith.truncf %87 : vector<8x128xf32> to vector<8x128xbf16>
    %cst_33 = arith.constant dense<0.000000e+00> : vector<8x128xf32>
    %89 = tpu.matmul %88, %9, %cst_33 {dimension_numbers = #tpu.dot_dimension_numbers<[1], [0], [0], [1], [0, 0, 1, 1], [], []>} : vector<8x128xbf16>, vector<128x128xbf16>, vector<8x128xf32> -> vector<8x128xf32>
    %90 = arith.addf %89, %15 : vector<8x128xf32>
    %91 = arith.index_cast %56 : i32 to index
    %c0_34 = arith.constant 0 : index
    %92 = vector.load %arg8[%91, %c0_34] : memref<64x128xf32, #tpu.memory_space<vmem>>, vector<8x128xf32>
    tpu.vector_store %arg8[%91, %c0_34], %90 {strides = array<i32>} : memref<64x128xf32, #tpu.memory_space<vmem>>, vector<8x128xf32>,
    %c2_i32 = arith.constant 2 : i32
    %c8_i32_35 = arith.constant 8 : i32
    %93 = arith.muli %c2_i32, %c8_i32_35 : i32
    %94 = tpu.assume_multiple %93, 8 : i32
    %95 = arith.index_cast %94 : i32 to index
    %c0_36 = arith.constant 0 : index
    %96 = vector.load %arg10[%95, %c0_36] : memref<64x384xf32, #tpu.memory_space<vmem>>, vector<8x384xf32>
    %97 = arith.truncf %87 : vector<8x128xf32> to vector<8x128xbf16>
    %cst_37 = arith.constant dense<0.000000e+00> : vector<8x256xf32>
    %98 = tpu.matmul %97, %7, %cst_37 {dimension_numbers = #tpu.dot_dimension_numbers<[1], [0], [0], [1], [0, 0, 1, 1], [], []>} : vector<8x128xbf16>, vector<128x256xbf16>, vector<8x256xf32> -> vector<8x256xf32>
    %cst_38 = arith.constant dense<0.000000e+00> : vector<8x128xf32>
    %99 = tpu.matmul %97, %8, %cst_38 {dimension_numbers = #tpu.dot_dimension_numbers<[1], [0], [0], [1], [0, 0, 1, 1], [], []>} : vector<8x128xbf16>, vector<128x128xbf16>, vector<8x128xf32> -> vector<8x128xf32>
    %100 = vector.extract_strided_slice %96 {offsets = [0, 0], sizes = [8, 128], strides = [1, 1]} : vector<8x384xf32> to vector<8x128xf32>
    %101 = vector.extract_strided_slice %98 {offsets = [0, 0], sizes = [8, 128], strides = [1, 1]} : vector<8x256xf32> to vector<8x128xf32>
    %102 = arith.addf %100, %101 : vector<8x128xf32>
    %103 = arith.negf %102 : vector<8x128xf32>
    %104 = math.exp %103 : vector<8x128xf32>
    %cst_39 = arith.constant 1.000000e+00 : f32
    %105 = vector.broadcast %cst_39 : f32 to vector<8x128xf32>
    %106 = arith.addf %105, %104 : vector<8x128xf32>
    %107 = arith.divf %105, %106 : vector<8x128xf32>
    %108 = vector.extract_strided_slice %96 {offsets = [0, 128], sizes = [8, 128], strides = [1, 1]} : vector<8x384xf32> to vector<8x128xf32>
    %109 = vector.extract_strided_slice %98 {offsets = [0, 128], sizes = [8, 128], strides = [1, 1]} : vector<8x256xf32> to vector<8x128xf32>
    %110 = arith.addf %108, %109 : vector<8x128xf32>
    %111 = arith.negf %110 : vector<8x128xf32>
    %112 = math.exp %111 : vector<8x128xf32>
    %cst_40 = arith.constant 1.000000e+00 : f32
    %113 = vector.broadcast %cst_40 : f32 to vector<8x128xf32>
    %114 = arith.addf %113, %112 : vector<8x128xf32>
    %115 = arith.divf %113, %114 : vector<8x128xf32>
    %116 = vector.extract_strided_slice %96 {offsets = [0, 256], sizes = [8, 128], strides = [1, 1]} : vector<8x384xf32> to vector<8x128xf32>
    %117 = arith.addf %99, %12 : vector<8x128xf32>
    %118 = arith.mulf %107, %117 : vector<8x128xf32>
    %119 = arith.addf %116, %118 : vector<8x128xf32>
    %120 = math.tanh %119 : vector<8x128xf32>
    %cst_41 = arith.constant 1.000000e+00 : f32
    %121 = vector.broadcast %cst_41 : f32 to vector<8x128xf32>
    %122 = arith.subf %121, %115 : vector<8x128xf32>
    %123 = arith.mulf %122, %120 : vector<8x128xf32>
    %124 = arith.mulf %115, %87 : vector<8x128xf32>
    %125 = arith.addf %123, %124 : vector<8x128xf32>
    %126 = arith.truncf %125 : vector<8x128xf32> to vector<8x128xbf16>
    %cst_42 = arith.constant dense<0.000000e+00> : vector<8x128xf32>
    %127 = tpu.matmul %126, %9, %cst_42 {dimension_numbers = #tpu.dot_dimension_numbers<[1], [0], [0], [1], [0, 0, 1, 1], [], []>} : vector<8x128xbf16>, vector<128x128xbf16>, vector<8x128xf32> -> vector<8x128xf32>
    %128 = arith.addf %127, %15 : vector<8x128xf32>
    %129 = arith.index_cast %94 : i32 to index
    %c0_43 = arith.constant 0 : index
    %130 = vector.load %arg8[%129, %c0_43] : memref<64x128xf32, #tpu.memory_space<vmem>>, vector<8x128xf32>
    tpu.vector_store %arg8[%129, %c0_43], %128 {strides = array<i32>} : memref<64x128xf32, #tpu.memory_space<vmem>>, vector<8x128xf32>,
    %c3_i32 = arith.constant 3 : i32
    %c8_i32_44 = arith.constant 8 : i32
    %131 = arith.muli %c3_i32, %c8_i32_44 : i32
    %132 = tpu.assume_multiple %131, 8 : i32
    %133 = arith.index_cast %132 : i32 to index
    %c0_45 = arith.constant 0 : index
    %134 = vector.load %arg10[%133, %c0_45] : memref<64x384xf32, #tpu.memory_space<vmem>>, vector<8x384xf32>
    %135 = arith.truncf %125 : vector<8x128xf32> to vector<8x128xbf16>
    %cst_46 = arith.constant dense<0.000000e+00> : vector<8x256xf32>
    %136 = tpu.matmul %135, %7, %cst_46 {dimension_numbers = #tpu.dot_dimension_numbers<[1], [0], [0], [1], [0, 0, 1, 1], [], []>} : vector<8x128xbf16>, vector<128x256xbf16>, vector<8x256xf32> -> vector<8x256xf32>
    %cst_47 = arith.constant dense<0.000000e+00> : vector<8x128xf32>
    %137 = tpu.matmul %135, %8, %cst_47 {dimension_numbers = #tpu.dot_dimension_numbers<[1], [0], [0], [1], [0, 0, 1, 1], [], []>} : vector<8x128xbf16>, vector<128x128xbf16>, vector<8x128xf32> -> vector<8x128xf32>
    %138 = vector.extract_strided_slice %134 {offsets = [0, 0], sizes = [8, 128], strides = [1, 1]} : vector<8x384xf32> to vector<8x128xf32>
    %139 = vector.extract_strided_slice %136 {offsets = [0, 0], sizes = [8, 128], strides = [1, 1]} : vector<8x256xf32> to vector<8x128xf32>
    %140 = arith.addf %138, %139 : vector<8x128xf32>
    %141 = arith.negf %140 : vector<8x128xf32>
    %142 = math.exp %141 : vector<8x128xf32>
    %cst_48 = arith.constant 1.000000e+00 : f32
    %143 = vector.broadcast %cst_48 : f32 to vector<8x128xf32>
    %144 = arith.addf %143, %142 : vector<8x128xf32>
    %145 = arith.divf %143, %144 : vector<8x128xf32>
    %146 = vector.extract_strided_slice %134 {offsets = [0, 128], sizes = [8, 128], strides = [1, 1]} : vector<8x384xf32> to vector<8x128xf32>
    %147 = vector.extract_strided_slice %136 {offsets = [0, 128], sizes = [8, 128], strides = [1, 1]} : vector<8x256xf32> to vector<8x128xf32>
    %148 = arith.addf %146, %147 : vector<8x128xf32>
    %149 = arith.negf %148 : vector<8x128xf32>
    %150 = math.exp %149 : vector<8x128xf32>
    %cst_49 = arith.constant 1.000000e+00 : f32
    %151 = vector.broadcast %cst_49 : f32 to vector<8x128xf32>
    %152 = arith.addf %151, %150 : vector<8x128xf32>
    %153 = arith.divf %151, %152 : vector<8x128xf32>
    %154 = vector.extract_strided_slice %134 {offsets = [0, 256], sizes = [8, 128], strides = [1, 1]} : vector<8x384xf32> to vector<8x128xf32>
    %155 = arith.addf %137, %12 : vector<8x128xf32>
    %156 = arith.mulf %145, %155 : vector<8x128xf32>
    %157 = arith.addf %154, %156 : vector<8x128xf32>
    %158 = math.tanh %157 : vector<8x128xf32>
    %cst_50 = arith.constant 1.000000e+00 : f32
    %159 = vector.broadcast %cst_50 : f32 to vector<8x128xf32>
    %160 = arith.subf %159, %153 : vector<8x128xf32>
    %161 = arith.mulf %160, %158 : vector<8x128xf32>
    %162 = arith.mulf %153, %125 : vector<8x128xf32>
    %163 = arith.addf %161, %162 : vector<8x128xf32>
    %164 = arith.truncf %163 : vector<8x128xf32> to vector<8x128xbf16>
    %cst_51 = arith.constant dense<0.000000e+00> : vector<8x128xf32>
    %165 = tpu.matmul %164, %9, %cst_51 {dimension_numbers = #tpu.dot_dimension_numbers<[1], [0], [0], [1], [0, 0, 1, 1], [], []>} : vector<8x128xbf16>, vector<128x128xbf16>, vector<8x128xf32> -> vector<8x128xf32>
    %166 = arith.addf %165, %15 : vector<8x128xf32>
    %167 = arith.index_cast %132 : i32 to index
    %c0_52 = arith.constant 0 : index
    %168 = vector.load %arg8[%167, %c0_52] : memref<64x128xf32, #tpu.memory_space<vmem>>, vector<8x128xf32>
    tpu.vector_store %arg8[%167, %c0_52], %166 {strides = array<i32>} : memref<64x128xf32, #tpu.memory_space<vmem>>, vector<8x128xf32>,
    %c4_i32 = arith.constant 4 : i32
    %c8_i32_53 = arith.constant 8 : i32
    %169 = arith.muli %c4_i32, %c8_i32_53 : i32
    %170 = tpu.assume_multiple %169, 8 : i32
    %171 = arith.index_cast %170 : i32 to index
    %c0_54 = arith.constant 0 : index
    %172 = vector.load %arg10[%171, %c0_54] : memref<64x384xf32, #tpu.memory_space<vmem>>, vector<8x384xf32>
    %173 = arith.truncf %163 : vector<8x128xf32> to vector<8x128xbf16>
    %cst_55 = arith.constant dense<0.000000e+00> : vector<8x256xf32>
    %174 = tpu.matmul %173, %7, %cst_55 {dimension_numbers = #tpu.dot_dimension_numbers<[1], [0], [0], [1], [0, 0, 1, 1], [], []>} : vector<8x128xbf16>, vector<128x256xbf16>, vector<8x256xf32> -> vector<8x256xf32>
    %cst_56 = arith.constant dense<0.000000e+00> : vector<8x128xf32>
    %175 = tpu.matmul %173, %8, %cst_56 {dimension_numbers = #tpu.dot_dimension_numbers<[1], [0], [0], [1], [0, 0, 1, 1], [], []>} : vector<8x128xbf16>, vector<128x128xbf16>, vector<8x128xf32> -> vector<8x128xf32>
    %176 = vector.extract_strided_slice %172 {offsets = [0, 0], sizes = [8, 128], strides = [1, 1]} : vector<8x384xf32> to vector<8x128xf32>
    %177 = vector.extract_strided_slice %174 {offsets = [0, 0], sizes = [8, 128], strides = [1, 1]} : vector<8x256xf32> to vector<8x128xf32>
    %178 = arith.addf %176, %177 : vector<8x128xf32>
    %179 = arith.negf %178 : vector<8x128xf32>
    %180 = math.exp %179 : vector<8x128xf32>
    %cst_57 = arith.constant 1.000000e+00 : f32
    %181 = vector.broadcast %cst_57 : f32 to vector<8x128xf32>
    %182 = arith.addf %181, %180 : vector<8x128xf32>
    %183 = arith.divf %181, %182 : vector<8x128xf32>
    %184 = vector.extract_strided_slice %172 {offsets = [0, 128], sizes = [8, 128], strides = [1, 1]} : vector<8x384xf32> to vector<8x128xf32>
    %185 = vector.extract_strided_slice %174 {offsets = [0, 128], sizes = [8, 128], strides = [1, 1]} : vector<8x256xf32> to vector<8x128xf32>
    %186 = arith.addf %184, %185 : vector<8x128xf32>
    %187 = arith.negf %186 : vector<8x128xf32>
    %188 = math.exp %187 : vector<8x128xf32>
    %cst_58 = arith.constant 1.000000e+00 : f32
    %189 = vector.broadcast %cst_58 : f32 to vector<8x128xf32>
    %190 = arith.addf %189, %188 : vector<8x128xf32>
    %191 = arith.divf %189, %190 : vector<8x128xf32>
    %192 = vector.extract_strided_slice %172 {offsets = [0, 256], sizes = [8, 128], strides = [1, 1]} : vector<8x384xf32> to vector<8x128xf32>
    %193 = arith.addf %175, %12 : vector<8x128xf32>
    %194 = arith.mulf %183, %193 : vector<8x128xf32>
    %195 = arith.addf %192, %194 : vector<8x128xf32>
    %196 = math.tanh %195 : vector<8x128xf32>
    %cst_59 = arith.constant 1.000000e+00 : f32
    %197 = vector.broadcast %cst_59 : f32 to vector<8x128xf32>
    %198 = arith.subf %197, %191 : vector<8x128xf32>
    %199 = arith.mulf %198, %196 : vector<8x128xf32>
    %200 = arith.mulf %191, %163 : vector<8x128xf32>
    %201 = arith.addf %199, %200 : vector<8x128xf32>
    %202 = arith.truncf %201 : vector<8x128xf32> to vector<8x128xbf16>
    %cst_60 = arith.constant dense<0.000000e+00> : vector<8x128xf32>
    %203 = tpu.matmul %202, %9, %cst_60 {dimension_numbers = #tpu.dot_dimension_numbers<[1], [0], [0], [1], [0, 0, 1, 1], [], []>} : vector<8x128xbf16>, vector<128x128xbf16>, vector<8x128xf32> -> vector<8x128xf32>
    %204 = arith.addf %203, %15 : vector<8x128xf32>
    %205 = arith.index_cast %170 : i32 to index
    %c0_61 = arith.constant 0 : index
    %206 = vector.load %arg8[%205, %c0_61] : memref<64x128xf32, #tpu.memory_space<vmem>>, vector<8x128xf32>
    tpu.vector_store %arg8[%205, %c0_61], %204 {strides = array<i32>} : memref<64x128xf32, #tpu.memory_space<vmem>>, vector<8x128xf32>,
    %c5_i32 = arith.constant 5 : i32
    %c8_i32_62 = arith.constant 8 : i32
    %207 = arith.muli %c5_i32, %c8_i32_62 : i32
    %208 = tpu.assume_multiple %207, 8 : i32
    %209 = arith.index_cast %208 : i32 to index
    %c0_63 = arith.constant 0 : index
    %210 = vector.load %arg10[%209, %c0_63] : memref<64x384xf32, #tpu.memory_space<vmem>>, vector<8x384xf32>
    %211 = arith.truncf %201 : vector<8x128xf32> to vector<8x128xbf16>
    %cst_64 = arith.constant dense<0.000000e+00> : vector<8x256xf32>
    %212 = tpu.matmul %211, %7, %cst_64 {dimension_numbers = #tpu.dot_dimension_numbers<[1], [0], [0], [1], [0, 0, 1, 1], [], []>} : vector<8x128xbf16>, vector<128x256xbf16>, vector<8x256xf32> -> vector<8x256xf32>
    %cst_65 = arith.constant dense<0.000000e+00> : vector<8x128xf32>
    %213 = tpu.matmul %211, %8, %cst_65 {dimension_numbers = #tpu.dot_dimension_numbers<[1], [0], [0], [1], [0, 0, 1, 1], [], []>} : vector<8x128xbf16>, vector<128x128xbf16>, vector<8x128xf32> -> vector<8x128xf32>
    %214 = vector.extract_strided_slice %210 {offsets = [0, 0], sizes = [8, 128], strides = [1, 1]} : vector<8x384xf32> to vector<8x128xf32>
    %215 = vector.extract_strided_slice %212 {offsets = [0, 0], sizes = [8, 128], strides = [1, 1]} : vector<8x256xf32> to vector<8x128xf32>
    %216 = arith.addf %214, %215 : vector<8x128xf32>
    %217 = arith.negf %216 : vector<8x128xf32>
    %218 = math.exp %217 : vector<8x128xf32>
    %cst_66 = arith.constant 1.000000e+00 : f32
    %219 = vector.broadcast %cst_66 : f32 to vector<8x128xf32>
    %220 = arith.addf %219, %218 : vector<8x128xf32>
    %221 = arith.divf %219, %220 : vector<8x128xf32>
    %222 = vector.extract_strided_slice %210 {offsets = [0, 128], sizes = [8, 128], strides = [1, 1]} : vector<8x384xf32> to vector<8x128xf32>
    %223 = vector.extract_strided_slice %212 {offsets = [0, 128], sizes = [8, 128], strides = [1, 1]} : vector<8x256xf32> to vector<8x128xf32>
    %224 = arith.addf %222, %223 : vector<8x128xf32>
    %225 = arith.negf %224 : vector<8x128xf32>
    %226 = math.exp %225 : vector<8x128xf32>
    %cst_67 = arith.constant 1.000000e+00 : f32
    %227 = vector.broadcast %cst_67 : f32 to vector<8x128xf32>
    %228 = arith.addf %227, %226 : vector<8x128xf32>
    %229 = arith.divf %227, %228 : vector<8x128xf32>
    %230 = vector.extract_strided_slice %210 {offsets = [0, 256], sizes = [8, 128], strides = [1, 1]} : vector<8x384xf32> to vector<8x128xf32>
    %231 = arith.addf %213, %12 : vector<8x128xf32>
    %232 = arith.mulf %221, %231 : vector<8x128xf32>
    %233 = arith.addf %230, %232 : vector<8x128xf32>
    %234 = math.tanh %233 : vector<8x128xf32>
    %cst_68 = arith.constant 1.000000e+00 : f32
    %235 = vector.broadcast %cst_68 : f32 to vector<8x128xf32>
    %236 = arith.subf %235, %229 : vector<8x128xf32>
    %237 = arith.mulf %236, %234 : vector<8x128xf32>
    %238 = arith.mulf %229, %201 : vector<8x128xf32>
    %239 = arith.addf %237, %238 : vector<8x128xf32>
    %240 = arith.truncf %239 : vector<8x128xf32> to vector<8x128xbf16>
    %cst_69 = arith.constant dense<0.000000e+00> : vector<8x128xf32>
    %241 = tpu.matmul %240, %9, %cst_69 {dimension_numbers = #tpu.dot_dimension_numbers<[1], [0], [0], [1], [0, 0, 1, 1], [], []>} : vector<8x128xbf16>, vector<128x128xbf16>, vector<8x128xf32> -> vector<8x128xf32>
    %242 = arith.addf %241, %15 : vector<8x128xf32>
    %243 = arith.index_cast %208 : i32 to index
    %c0_70 = arith.constant 0 : index
    %244 = vector.load %arg8[%243, %c0_70] : memref<64x128xf32, #tpu.memory_space<vmem>>, vector<8x128xf32>
    tpu.vector_store %arg8[%243, %c0_70], %242 {strides = array<i32>} : memref<64x128xf32, #tpu.memory_space<vmem>>, vector<8x128xf32>,
    %c6_i32 = arith.constant 6 : i32
    %c8_i32_71 = arith.constant 8 : i32
    %245 = arith.muli %c6_i32, %c8_i32_71 : i32
    %246 = tpu.assume_multiple %245, 8 : i32
    %247 = arith.index_cast %246 : i32 to index
    %c0_72 = arith.constant 0 : index
    %248 = vector.load %arg10[%247, %c0_72] : memref<64x384xf32, #tpu.memory_space<vmem>>, vector<8x384xf32>
    %249 = arith.truncf %239 : vector<8x128xf32> to vector<8x128xbf16>
    %cst_73 = arith.constant dense<0.000000e+00> : vector<8x256xf32>
    %250 = tpu.matmul %249, %7, %cst_73 {dimension_numbers = #tpu.dot_dimension_numbers<[1], [0], [0], [1], [0, 0, 1, 1], [], []>} : vector<8x128xbf16>, vector<128x256xbf16>, vector<8x256xf32> -> vector<8x256xf32>
    %cst_74 = arith.constant dense<0.000000e+00> : vector<8x128xf32>
    %251 = tpu.matmul %249, %8, %cst_74 {dimension_numbers = #tpu.dot_dimension_numbers<[1], [0], [0], [1], [0, 0, 1, 1], [], []>} : vector<8x128xbf16>, vector<128x128xbf16>, vector<8x128xf32> -> vector<8x128xf32>
    %252 = vector.extract_strided_slice %248 {offsets = [0, 0], sizes = [8, 128], strides = [1, 1]} : vector<8x384xf32> to vector<8x128xf32>
    %253 = vector.extract_strided_slice %250 {offsets = [0, 0], sizes = [8, 128], strides = [1, 1]} : vector<8x256xf32> to vector<8x128xf32>
    %254 = arith.addf %252, %253 : vector<8x128xf32>
    %255 = arith.negf %254 : vector<8x128xf32>
    %256 = math.exp %255 : vector<8x128xf32>
    %cst_75 = arith.constant 1.000000e+00 : f32
    %257 = vector.broadcast %cst_75 : f32 to vector<8x128xf32>
    %258 = arith.addf %257, %256 : vector<8x128xf32>
    %259 = arith.divf %257, %258 : vector<8x128xf32>
    %260 = vector.extract_strided_slice %248 {offsets = [0, 128], sizes = [8, 128], strides = [1, 1]} : vector<8x384xf32> to vector<8x128xf32>
    %261 = vector.extract_strided_slice %250 {offsets = [0, 128], sizes = [8, 128], strides = [1, 1]} : vector<8x256xf32> to vector<8x128xf32>
    %262 = arith.addf %260, %261 : vector<8x128xf32>
    %263 = arith.negf %262 : vector<8x128xf32>
    %264 = math.exp %263 : vector<8x128xf32>
    %cst_76 = arith.constant 1.000000e+00 : f32
    %265 = vector.broadcast %cst_76 : f32 to vector<8x128xf32>
    %266 = arith.addf %265, %264 : vector<8x128xf32>
    %267 = arith.divf %265, %266 : vector<8x128xf32>
    %268 = vector.extract_strided_slice %248 {offsets = [0, 256], sizes = [8, 128], strides = [1, 1]} : vector<8x384xf32> to vector<8x128xf32>
    %269 = arith.addf %251, %12 : vector<8x128xf32>
    %270 = arith.mulf %259, %269 : vector<8x128xf32>
    %271 = arith.addf %268, %270 : vector<8x128xf32>
    %272 = math.tanh %271 : vector<8x128xf32>
    %cst_77 = arith.constant 1.000000e+00 : f32
    %273 = vector.broadcast %cst_77 : f32 to vector<8x128xf32>
    %274 = arith.subf %273, %267 : vector<8x128xf32>
    %275 = arith.mulf %274, %272 : vector<8x128xf32>
    %276 = arith.mulf %267, %239 : vector<8x128xf32>
    %277 = arith.addf %275, %276 : vector<8x128xf32>
    %278 = arith.truncf %277 : vector<8x128xf32> to vector<8x128xbf16>
    %cst_78 = arith.constant dense<0.000000e+00> : vector<8x128xf32>
    %279 = tpu.matmul %278, %9, %cst_78 {dimension_numbers = #tpu.dot_dimension_numbers<[1], [0], [0], [1], [0, 0, 1, 1], [], []>} : vector<8x128xbf16>, vector<128x128xbf16>, vector<8x128xf32> -> vector<8x128xf32>
    %280 = arith.addf %279, %15 : vector<8x128xf32>
    %281 = arith.index_cast %246 : i32 to index
    %c0_79 = arith.constant 0 : index
    %282 = vector.load %arg8[%281, %c0_79] : memref<64x128xf32, #tpu.memory_space<vmem>>, vector<8x128xf32>
    tpu.vector_store %arg8[%281, %c0_79], %280 {strides = array<i32>} : memref<64x128xf32, #tpu.memory_space<vmem>>, vector<8x128xf32>,
    %c7_i32 = arith.constant 7 : i32
    %c8_i32_80 = arith.constant 8 : i32
    %283 = arith.muli %c7_i32, %c8_i32_80 : i32
    %284 = tpu.assume_multiple %283, 8 : i32
    %285 = arith.index_cast %284 : i32 to index
    %c0_81 = arith.constant 0 : index
    %286 = vector.load %arg10[%285, %c0_81] : memref<64x384xf32, #tpu.memory_space<vmem>>, vector<8x384xf32>
    %287 = arith.truncf %277 : vector<8x128xf32> to vector<8x128xbf16>
    %cst_82 = arith.constant dense<0.000000e+00> : vector<8x256xf32>
    %288 = tpu.matmul %287, %7, %cst_82 {dimension_numbers = #tpu.dot_dimension_numbers<[1], [0], [0], [1], [0, 0, 1, 1], [], []>} : vector<8x128xbf16>, vector<128x256xbf16>, vector<8x256xf32> -> vector<8x256xf32>
    %cst_83 = arith.constant dense<0.000000e+00> : vector<8x128xf32>
    %289 = tpu.matmul %287, %8, %cst_83 {dimension_numbers = #tpu.dot_dimension_numbers<[1], [0], [0], [1], [0, 0, 1, 1], [], []>} : vector<8x128xbf16>, vector<128x128xbf16>, vector<8x128xf32> -> vector<8x128xf32>
    %290 = vector.extract_strided_slice %286 {offsets = [0, 0], sizes = [8, 128], strides = [1, 1]} : vector<8x384xf32> to vector<8x128xf32>
    %291 = vector.extract_strided_slice %288 {offsets = [0, 0], sizes = [8, 128], strides = [1, 1]} : vector<8x256xf32> to vector<8x128xf32>
    %292 = arith.addf %290, %291 : vector<8x128xf32>
    %293 = arith.negf %292 : vector<8x128xf32>
    %294 = math.exp %293 : vector<8x128xf32>
    %cst_84 = arith.constant 1.000000e+00 : f32
    %295 = vector.broadcast %cst_84 : f32 to vector<8x128xf32>
    %296 = arith.addf %295, %294 : vector<8x128xf32>
    %297 = arith.divf %295, %296 : vector<8x128xf32>
    %298 = vector.extract_strided_slice %286 {offsets = [0, 128], sizes = [8, 128], strides = [1, 1]} : vector<8x384xf32> to vector<8x128xf32>
    %299 = vector.extract_strided_slice %288 {offsets = [0, 128], sizes = [8, 128], strides = [1, 1]} : vector<8x256xf32> to vector<8x128xf32>
    %300 = arith.addf %298, %299 : vector<8x128xf32>
    %301 = arith.negf %300 : vector<8x128xf32>
    %302 = math.exp %301 : vector<8x128xf32>
    %cst_85 = arith.constant 1.000000e+00 : f32
    %303 = vector.broadcast %cst_85 : f32 to vector<8x128xf32>
    %304 = arith.addf %303, %302 : vector<8x128xf32>
    %305 = arith.divf %303, %304 : vector<8x128xf32>
    %306 = vector.extract_strided_slice %286 {offsets = [0, 256], sizes = [8, 128], strides = [1, 1]} : vector<8x384xf32> to vector<8x128xf32>
    %307 = arith.addf %289, %12 : vector<8x128xf32>
    %308 = arith.mulf %297, %307 : vector<8x128xf32>
    %309 = arith.addf %306, %308 : vector<8x128xf32>
    %310 = math.tanh %309 : vector<8x128xf32>
    %cst_86 = arith.constant 1.000000e+00 : f32
    %311 = vector.broadcast %cst_86 : f32 to vector<8x128xf32>
    %312 = arith.subf %311, %305 : vector<8x128xf32>
    %313 = arith.mulf %312, %310 : vector<8x128xf32>
    %314 = arith.mulf %305, %277 : vector<8x128xf32>
    %315 = arith.addf %313, %314 : vector<8x128xf32>
    %316 = arith.truncf %315 : vector<8x128xf32> to vector<8x128xbf16>
    %cst_87 = arith.constant dense<0.000000e+00> : vector<8x128xf32>
    %317 = tpu.matmul %316, %9, %cst_87 {dimension_numbers = #tpu.dot_dimension_numbers<[1], [0], [0], [1], [0, 0, 1, 1], [], []>} : vector<8x128xbf16>, vector<128x128xbf16>, vector<8x128xf32> -> vector<8x128xf32>
    %318 = arith.addf %317, %15 : vector<8x128xf32>
    %319 = arith.index_cast %284 : i32 to index
    %c0_88 = arith.constant 0 : index
    %320 = vector.load %arg8[%319, %c0_88] : memref<64x128xf32, #tpu.memory_space<vmem>>, vector<8x128xf32>
    tpu.vector_store %arg8[%319, %c0_88], %318 {strides = array<i32>} : memref<64x128xf32, #tpu.memory_space<vmem>>, vector<8x128xf32>,
    %c8_i32_89 = arith.constant 8 : i32
    %c0_90 = arith.constant 0 : index
    %c0_91 = arith.constant 0 : index
    %321 = vector.load %arg9[%c0_90, %c0_91] : memref<8x128xf32, #tpu.memory_space<vmem>>, vector<8x128xf32>
    tpu.vector_store %arg9[%c0_90, %c0_91], %315 {strides = array<i32>} : memref<8x128xf32, #tpu.memory_space<vmem>>, vector<8x128xf32>,
    return
  }
}

</mosaic_0001>

<bundles_post_ra>
// kernel: rnn_decoder_forward.1
= control target key start
LH: loop header
LB: loop body
LE: loop exit
PB: predicated region body
PF: predicated region fallthrough
CT: control target
= control target key end

     0   :  { %15 = vsyncpa [#allocation4], 0  ;;  %s3516_s0 = inlined_call_operand.vmem [shape: bf16[64,16], index: 0, kind: input, shape index: {}]   ;;  %s3517_s1 = inlined_call_operand.vmem [shape: bf16[16,384], index: 1, kind: input, shape index: {}]   ;;  %s3518_s2 = inlined_call_operand.vmem [shape: bf16[128,256], index: 2, kind: input, shape index: {}]   ;;  %s3519_s3 = inlined_call_operand.hbm [shape: bf16[128,128], index: 3, kind: input, shape index: {}]   ;;  %s3520_s4 = inlined_call_operand.hbm [shape: f32[1,384], index: 4, kind: input, shape index: {}]   ;;  %s3521_s5 = inlined_call_operand.vmem [shape: f32[1,128], index: 5, kind: input, shape index: {}]   ;;  %s3522_s6 = inlined_call_operand.hbm [shape: bf16[128,128], index: 6, kind: input, shape index: {}]   ;;  %s3523_s7 = inlined_call_operand.vmem [shape: f32[1,128], index: 7, kind: input, shape index: {}]   ;;  %s3524_s8 = inlined_call_operand.vmem [shape: f32[64,128], index: 8, kind: output, shape index: {0}]   ;;  %s3525_s9 = inlined_call_operand.vmem [shape: f32[8,128], index: 9, kind: output, shape index: {1}]  }
   0x1   :  { %16 = vsyncpa [#allocation6], 0  ;;  %s2565_s30 = smov [#allocation5]   ;;  %s2566_s11 = smov [#allocation3]  }
   0x2   :  { %s41_s10 = sshll.u32 %s2565_s30, 4  ;;  %s28_s12 = sshll.u32 %s2566_s11, 4  ;;  %s42_s10 = int_to_ptr.vmem [resolvable:$true] %s41_s10  ;;  %s2623_s12 = int_to_ptr.vmem [resolvable:$true] %s28_s12 }
   0x3   :  { %s2495_s15 = scalar_lea.hbm %s3520_s4, 48 }
   0x4   :  { %p2496_p0 = scmp.ne.s32.totalorder %s3520_s4, %s2495_s15  ;;  %p2499_p1 = scmp.lt.u32.totalorder %s2495_s15, %s3520_s4 }
   0x6   :  { %p2501_p2 = pnand %p2499_p1, %p2496_p0 }
   0x8   :  { %2504 = shalt.err (!%p2501_p2)
}
   0x9   :  { %s2505_s20 = scalar_lea.vmem %s42_s10, 48  ;;  %s2509_s21 = scalar_lea.vmem %s42_s10, 64 }
   0xa   :  { %p2506_p3 = scmp.ne.s32.totalorder %s42_s10, %s2505_s20  ;;  %p2510_p4 = scmp.lt.s32.totalorder %s42_s10, %s42_s10 }
   0xb   :  { %p2511_p5 = scmp.lt.s32.totalorder %s2509_s21, %s2505_s20 }
   0xd   :  { %p2512_p6 = por %p2511_p5, %p2510_p4 }
   0xf   :  { %p2513_p7 = pnand %p2512_p6, %p2506_p3 }
  0x11   :  { %2516 = shalt.err (!%p2513_p7)
}
  0x12   :  { %44 = dma.hbm_to_vmem [thread:$0]  %s3520_s4, 48, %s42_s10, [#allocation6]  }
  0x13   :  { %s2517_s26 = scalar_lea.hbm %s3519_s3, 1024 }
  0x14   :  { %p2518_p8 = scmp.ne.s32.totalorder %s3519_s3, %s2517_s26  ;;  %p2521_p9 = scmp.lt.u32.totalorder %s2517_s26, %s3519_s3 }
  0x16   :  { %p2523_p10 = pnand %p2521_p9, %p2518_p8 }
  0x18   :  { %2526 = shalt.err (!%p2523_p10)
}
  0x19   :  { %s2527_s11 = scalar_lea.vmem %s2623_s12, 1024  ;;  %p2532_p12 = scmp.lt.s32.totalorder %s2623_s12, %s2623_s12 }
  0x1a   :  { %p2528_p11 = scmp.ne.s32.totalorder %s2623_s12, %s2527_s11  ;;  %p2533_p13 = scmp.lt.s32.totalorder %s2527_s11, %s2527_s11 }
  0x1c   :  { %p2534_p0 = por %p2533_p13, %p2532_p12 }
  0x1e   :  { %p2535_p1 = pnand %p2534_p0, %p2528_p11 }
  0x20   :  { %2538 = shalt.err (!%p2535_p1)
}
  0x21   :  { %s2567_s4 = smov 64   ;;  %s2568_s10 = smov 4  }
  0x22   :  { %34 = dma.hbm_to_vmem [thread:$0]  %s3519_s3, 1024, %s2623_s12, [#allocation4], %s2567_s4, %s2567_s4, %s2568_s10  }
  0x23   :  { %s2569_s15 = smov [#allocation7]   ;;  %s2539_s19 = scalar_lea.hbm %s3522_s6, 1024 }
  0x24   :  { %s52_s16 = sshll.u32 %s2569_s15, 4  ;;  %p2540_p2 = scmp.ne.s32.totalorder %s3522_s6, %s2539_s19  ;;  %s53_s16 = int_to_ptr.vmem [resolvable:$true] %s52_s16 }
  0x25   :  { %p2543_p3 = scmp.lt.u32.totalorder %s2539_s19, %s3522_s6 }
  0x27   :  { %p2545_p4 = pnand %p2543_p3, %p2540_p2 }
  0x29   :  { %2548 = shalt.err (!%p2545_p4)
}
  0x2a   :  { %s2549_s24 = scalar_lea.vmem %s53_s16, 1024  ;;  %p2554_p6 = scmp.lt.s32.totalorder %s53_s16, %s53_s16 }
  0x2b   :  { %p2550_p5 = scmp.ne.s32.totalorder %s53_s16, %s2549_s24  ;;  %p2555_p7 = scmp.lt.s32.totalorder %s2549_s24, %s2549_s24 }
  0x2d   :  { %p2556_p8 = por %p2555_p7, %p2554_p6 }
  0x2f   :  { %p2557_p9 = pnand %p2556_p8, %p2550_p5 }
  0x31   :  { %2560 = shalt.err (!%p2557_p9)
}
  0x32   :  { %58 = dma.hbm_to_vmem [thread:$0]  %s3522_s6, 1024, %s53_s16, [#allocation6], %s2567_s4, %s2567_s4, %s2568_s10  }
  0x33   :  { %2561 = dma.done.wait [#allocation4], 1024  }
  0x34   :  { %2562 = vsyncadd [#allocation4], 4294966272 }
  0x35   :  { %2563 = dma.done.wait [#allocation6], 1072  }
  0x36   :  { %2564 = vsyncadd [#allocation6], 4294966224  ;;  %v3526_v0 = vmov 0   ;;  %v2333_v1 = vld [vmem:[%s3517_s1 + $0x4] ss:$12 sps:$4 sm:$0xff]   ;;  %vm136_vm0 = vcmask 130048   ;;  %v85_v41 = vlaneseq }
  0x37   :  { %181 = vmatprep.mubr.bf16.mxu0 %v3526_v0  ;;  %v2335_v2 = vld [vmem:[%s3517_s1] ss:$12 sps:$4 sm:$0xff]   ;;  %149 = vmatprep.subr.bf16.mxu0 %v2333_v1  ;;  %v2689_v6 = vld [vmem:[%s3518_s2 + $0x14] ss:$8 sps:$4 sm:$0xff]   ;;  %v2698_v7 = vld [vmem:[%s3518_s2 + $0x10] ss:$8 sps:$4 sm:$0xff]  }
  0x38   :  { %v2336_v3 = vld [vmem:[%s3516_s0] sm:$0xff]   ;;  %150 = vmatpush1.bf16.msra.mxu0 %v2335_v2  ;;  %v2343_v9 = vld [vmem:[%s3516_s0 + $0x8] sm:$0xff]   ;;  %v2723_v12 = vld [vmem:[%s3518_s2 + $0x34] ss:$8 sps:$4 sm:$0xff]   ;;  %v3528_v16 = vmov 0.0   ;;  %vm2572_vm1 = vmmov 0  }
  0x39   :  { %v2679_v4 = vld [vmem:[%s3518_s2 + $0x4] ss:$8 sps:$4 sm:$0xff]   ;;  %v2684_v5 = vld [vmem:[%s3518_s2] ss:$8 sps:$4 sm:$0xff]   ;;  %1997 = vmatprep.mubr.msk.bf16.mxu1 %vm136_vm0, %v2336_v3  ;;  %v2729_v13 = vld [vmem:[%s3518_s2 + $0x30] ss:$8 sps:$4 sm:$0xff]  }
  0x3a   :  { %459 = vmatprep.subr.bf16.mxu0 %v2679_v4  ;;  %v2705_v8 = vld [vmem:[%s3518_s2 + $0x24] ss:$8 sps:$4 sm:$0xff]   ;;  %v2713_v10 = vld [vmem:[%s3518_s2 + $0x20] ss:$8 sps:$4 sm:$0xff]   ;;  %v2350_v14 = vld [vmem:[%s3516_s0 + $0x10] sm:$0xff]   ;;  %v86_v42 = vshrl.u32 %v85_v41, 7 }
  0x3b   :  { %1781 = vmatmul.mubr.msk.bf16.vlgmr.msra.gmra.mrb[0].mxu0 %vm136_vm0, %v2336_v3  ;;  %v2354_v11 = vld [vmem:[%s3517_s1 + $0x8] ss:$12 sps:$4 sm:$0xff]   ;;  %v2739_v15 = vld [vmem:[%s3518_s2 + $0x44] ss:$8 sps:$4 sm:$0xff]   ;;  %v2743_v17 = vld [vmem:[#allocation3] sm:$0xff]  }
  0x3c   :  { %460 = vmatpush1.bf16.msra.mxu0 %v2684_v5  ;;  %191 = vmatprep.mubr.bf16.mxu0 %v3526_v0  ;;  %v2747_v18 = vld [vmem:[#allocation3 + $0x8] sm:$0xff]   ;;  %v2761_v20 = vld [vmem:[%s3518_s2 + $0x54] ss:$8 sps:$4 sm:$0xff]   ;;  %v2766_v21 = vld [vmem:[%s3518_s2 + $0x50] ss:$8 sps:$4 sm:$0xff]   ;;  %v87_v43 = vsub.s32 0, %v86_v42 }
  0x3d   :  { %461 = vmatprep.subr.bf16.mxu0 %v2689_v6  ;;  %1995 = vmatprep.subr.bf16.mxu1 %v2354_v11  ;;  %v2754_v19 = vld [vmem:[%s3518_s2 + $0x40] ss:$8 sps:$4 sm:$0xff]   ;;  %v2358_v23 = vld [vmem:[%s3516_s0 + $0x18] sm:$0xff]   ;;  %v2781_v24 = vld [vmem:[%s3518_s2 + $0x64] ss:$8 sps:$4 sm:$0xff]   ;;  %v91_v45 = vsub.s32 1, %v86_v42 }
  0x3e   :  { %1996 = vmatpush3.bf16.msra.mxu1 %v2354_v11  ;;  %v2770_v22 = vld [vmem:[#allocation3 + $0x10] sm:$0xff]   ;;  %v2789_v26 = vld [vmem:[#allocation3 + $0x18] sm:$0xff]   ;;  %v2805_v28 = vld [vmem:[#allocation3 + $0x20] sm:$0xff]   ;;  %v95_v54 = vsub.s32 2, %v86_v42 }
  0x3f   :  { %2005 = vmatprep.subr.bf16.mxu1 %v3528_v16  ;;  %v2787_v25 = vld [vmem:[%s3518_s2 + $0x60] ss:$8 sps:$4 sm:$0xff]   ;;  %v2795_v27 = vld [vmem:[%s3518_s2 + $0x74] ss:$8 sps:$4 sm:$0xff]   ;;  %v2811_v29 = vld [vmem:[%s3518_s2 + $0x70] ss:$8 sps:$4 sm:$0xff]  }
  0x40   :  { %462 = vmatpush1.bf16.msra.mxu0 %v2698_v7  ;;  %v2817_v30 = vld [vmem:[#allocation3 + $0x28] sm:$0xff]   ;;  %v2824_v31 = vld [vmem:[#allocation3 + $0x30] sm:$0xff]   ;;  %v2830_v32 = vld [vmem:[#allocation3 + $0x38] sm:$0xff]  }
  0x41   :  { %463 = vmatprep.subr.bf16.mxu0 %v2705_v8  ;;  %1998 = vmatmul.mubr.msk.bf16.vlgmr.msra.gmra.mrb[0].mxu1 %vm136_vm0, %v2343_v9  ;;  %v2853_v33 = vld [vmem:[#allocation7] sm:$0xff]   ;;  %v2857_v34 = vld [vmem:[#allocation7 + $0x8] sm:$0xff]   ;;  %v2861_v35 = vld [vmem:[#allocation7 + $0x10] sm:$0xff]  }
  0x42   :  { %2006 = vmatpush3.bf16.msra.mxu1 %v2743_v17  ;;  %2001 = vmatprep.mubr.msk.bf16.mxu1 %vm136_vm0, %v2350_v14  ;;  %v2865_v36 = vld [vmem:[#allocation7 + $0x18] sm:$0xff]   ;;  %v2869_v37 = vld [vmem:[#allocation7 + $0x20] sm:$0xff]   ;;  %v2872_v38 = vld [vmem:[#allocation7 + $0x28] sm:$0xff]  }
  0x43   :  { %1782 = vmatmul.mubr.msk.bf16.gmra.mrb[4].mxu0 %vm136_vm0, %v2343_v9  ;;  %2007 = vmatprep.subr.bf16.mxu1 %v3528_v16  ;;  %v2876_v39 = vld [vmem:[#allocation7 + $0x30] sm:$0xff]   ;;  %v2880_v40 = vld [vmem:[#allocation7 + $0x38] sm:$0xff]  }
  0x44   :  { %464 = vmatpush1.bf16.msra.mxu0 %v2713_v10  ;;  %201 = vmatprep.mubr.bf16.mxu0 %v3526_v0  ;;  %v83_v44 = vld [vmem:[#allocation5] sm:$0x7] }
  0x45   :  { %465 = vmatprep.subr.bf16.mxu0 %v2723_v12  ;;  %v88_v47 = vrot.slane %v83_v44, %v87_v43  ;;  %v92_v49 = vrot.slane %v83_v44, %v91_v45  ;;  %v2889_v56 = vrot.slane %v83_v44, %v95_v54 }
  0x46   :  { %2008 = vmatpush3.bf16.msra.mxu1 %v2747_v18 }
  0x47   :  { %2009 = vmatprep.subr.bf16.mxu1 %v3528_v16 }
  0x48   :  { %466 = vmatpush1.bf16.msra.mxu0 %v2729_v13 }
  0x49   :  { %467 = vmatprep.subr.bf16.mxu0 %v2739_v15  ;;  %2002 = vmatmul.mubr.msk.bf16.gmra.mrb[4].mxu1 %vm136_vm0, %v2358_v23 }
  0x4a   :  { %2010 = vmatpush3.bf16.msra.mxu1 %v2770_v22  ;;  %2021 = vmatprep.mubr.msk.bf16.mxu1 %vm2572_vm1, %v3528_v16 }
  0x4b   :  { %1783 = vmatmul.mubr.msk.bf16.gmra.mrb[8].mxu0 %vm136_vm0, %v2350_v14  ;;  %2011 = vmatprep.subr.bf16.mxu1 %v3528_v16 }
  0x4c   :  { %468 = vmatpush1.bf16.msra.mxu0 %v2754_v19  ;;  %211 = vmatprep.mubr.bf16.mxu0 %v3526_v0 }
  0x4d   :  { %469 = vmatprep.subr.bf16.mxu0 %v2761_v20 }
  0x4e   :  { %2012 = vmatpush3.bf16.msra.mxu1 %v2789_v26 }
  0x4f   :  { %2013 = vmatprep.subr.bf16.mxu1 %v3528_v16 }
  0x50   :  { %470 = vmatpush1.bf16.msra.mxu0 %v2766_v21 }
  0x51   :  { %471 = vmatprep.subr.bf16.mxu0 %v2781_v24 }
  0x52   :  { %2014 = vmatpush3.bf16.msra.mxu1 %v2805_v28 }
  0x53   :  { %1784 = vmatmul.mubr.msk.bf16.gmra.mrb[12].mxu0 %vm136_vm0, %v2358_v23  ;;  %2015 = vmatprep.subr.bf16.mxu1 %v3528_v16 }
  0x54   :  { %472 = vmatpush1.bf16.msra.mxu0 %v2787_v25  ;;  %491 = vmatprep.mubr.bf16.mxu0 %v3526_v0 }
  0x55   :  { %473 = vmatprep.subr.bf16.mxu0 %v2795_v27 }
  0x56   :  { %2016 = vmatpush3.bf16.msra.mxu1 %v2817_v30 }
  0x57   :  { %2017 = vmatprep.subr.bf16.mxu1 %v3528_v16 }
  0x58   :  { %474 = vmatpush1.bf16.msra.mxu0 %v2811_v29 }
  0x59   :  { %2025 = vmatprep.subr.bf16.mxu0 %v3528_v16 }
  0x5a   :  { %2018 = vmatpush3.bf16.msra.mxu1 %v2824_v31 }
  0x5b   :  { %492 = vmatmul.mubr.bf16.vlgmr.msra.gmra.mrb[16].mxu0 %v3526_v0  ;;  %2019 = vmatprep.subr.bf16.mxu1 %v3528_v16 }
  0x5c   :  { %2041 = vmatprep.mubr.msk.bf16.mxu0 %vm2572_vm1, %v3528_v16  ;;  %2026 = vmatpush3.bf16.msra.mxu0 %v2853_v33 }
  0x5d   :  { %2027 = vmatprep.subr.bf16.mxu0 %v3528_v16 }
  0x5e   :  { %2020 = vmatpush3.bf16.msra.mxu1 %v2830_v32 }
  0x5f   :  { %705 = vmatprep.subr.bf16.mxu1 %v2679_v4 }
  0x60   :  { %2028 = vmatpush3.bf16.msra.mxu0 %v2857_v34 }
  0x61   :  { %2022 = vmatmul.mubr.bf16.vlgmr.msra.gmra.mrb[8].mxu1 %v3526_v0  ;;  %2029 = vmatprep.subr.bf16.mxu0 %v3528_v16 }
  0x62   :  { %706 = vmatpush1.bf16.msra.mxu1 %v2684_v5  ;;  %737 = vmatprep.mubr.bf16.mxu1 %v3526_v0 }
  0x63   :  { %707 = vmatprep.subr.bf16.mxu1 %v2689_v6 }
  0x64   :  { %2030 = vmatpush3.bf16.msra.mxu0 %v2861_v35 }
  0x65   :  { %2031 = vmatprep.subr.bf16.mxu0 %v3528_v16 }
  0x66   :  { %708 = vmatpush1.bf16.msra.mxu1 %v2698_v7 }
  0x67   :  { %709 = vmatprep.subr.bf16.mxu1 %v2705_v8 }
  0x68   :  { %2032 = vmatpush3.bf16.msra.mxu0 %v2865_v36 }
  0x69   :  { %2033 = vmatprep.subr.bf16.mxu0 %v3528_v16 }
  0x6a   :  { %710 = vmatpush1.bf16.msra.mxu1 %v2713_v10 }
  0x6b   :  { %711 = vmatprep.subr.bf16.mxu1 %v2723_v12 }
  0x6c   :  { %2034 = vmatpush3.bf16.msra.mxu0 %v2869_v37 }
  0x6d   :  { %2035 = vmatprep.subr.bf16.mxu0 %v3528_v16 }
  0x6e   :  { %712 = vmatpush1.bf16.msra.mxu1 %v2729_v13 }
  0x6f   :  { %713 = vmatprep.subr.bf16.mxu1 %v2739_v15 }
  0x70   :  { %2036 = vmatpush3.bf16.msra.mxu0 %v2872_v38 }
  0x71   :  { %2037 = vmatprep.subr.bf16.mxu0 %v3528_v16 }
  0x72   :  { %714 = vmatpush1.bf16.msra.mxu1 %v2754_v19 }
  0x73   :  { %715 = vmatprep.subr.bf16.mxu1 %v2761_v20 }
  0x74   :  { %2038 = vmatpush3.bf16.msra.mxu0 %v2876_v39 }
  0x75   :  { %2039 = vmatprep.subr.bf16.mxu0 %v3528_v16 }
  0x76   :  { %716 = vmatpush1.bf16.msra.mxu1 %v2766_v21 }
  0x77   :  { %717 = vmatprep.subr.bf16.mxu1 %v2781_v24 }
  0x78   :  { %2040 = vmatpush3.bf16.msra.mxu0 %v2880_v40 }
  0x79   :  { %2045 = vmatprep.subr.bf16.mxu0 %v3528_v16 }
  0x7a   :  { %718 = vmatpush1.bf16.msra.mxu1 %v2787_v25 }
  0x7b   :  { %719 = vmatprep.subr.bf16.mxu1 %v2795_v27 }
  0x7e   :  { %720 = vmatpush1.bf16.msra.mxu1 %v2811_v29 }
  0x7f   :  { %2065 = vmatprep.subr.bf16.mxu1 %v3528_v16 }
 0x10e   :  { %v183_v46 = vpop.f32.mrb[0].mxu0 }
 0x10f   :  { %v185_v48 = vpop.f32.mrb[1].mxu0 }
 0x110   :  { %v187_v50 = vpop.f32.mrb[2].mxu0 }
 0x111   :  { %v2885_v51 = vadd.f32 %v187_v50, %v88_v47  ;;  %v189_v52 = vpop.f32.mrb[3].mxu0 }
 0x112   :  { %v2887_v53 = vadd.f32 %v189_v52, %v92_v49 }
 0x114   :  { %v1999_v63 = vpop.f32.mrb[0].mxu1 }
 0x115   :  { %v2900_v2 = vadd.f32 %v1999_v63, %v2889_v56  ;;  %v256_v3 = vpop.f32.mrb[1].mxu1 }
 0x116   :  { %v193_v55 = vpop.f32.mrb[4].mxu0  ;;  %v2000_v9 = vpop.f32.mrb[2].mxu1 }
 0x117   :  { %v2891_v57 = vadd.f32 %v193_v55, %v88_v47  ;;  %v195_v58 = vpop.f32.mrb[5].mxu0  ;;  %v2903_v11 = vadd.f32 %v2000_v9, %v2889_v56  ;;  %v259_v14 = vpop.f32.mrb[3].mxu1 }
 0x118   :  { %v2893_v59 = vadd.f32 %v195_v58, %v92_v49  ;;  %v197_v60 = vpop.f32.mrb[6].mxu0  ;;  %v2906_v23 = vadd.f32 %v259_v14, %v2889_v56 }
 0x119   :  { %v2895_v61 = vadd.f32 %v197_v60, %v88_v47  ;;  %v199_v62 = vpop.f32.mrb[7].mxu0  ;;  %3530 = vst [vmem:[#allocation10_spill] sm:$0xff] %v2903_v11 }
 0x11a   :  { %v2897_v1 = vadd.f32 %v199_v62, %v92_v49 }
 0x11c   :  { %v2003_v54 = vpop.f32.mrb[4].mxu1 }
 0x11d   :  { %v2917_v58 = vadd.f32 %v2003_v54, %v2889_v56  ;;  %v272_v60 = vpop.f32.mrb[5].mxu1 }
 0x11e   :  { %v203_v41 = vpop.f32.mrb[8].mxu0  ;;  %v2920_v62 = vadd.f32 %v272_v60, %v2889_v56  ;;  %v2004_v63 = vpop.f32.mrb[6].mxu1 }
 0x11f   :  { %v2908_v42 = vadd.f32 %v203_v41, %v88_v47  ;;  %v205_v43 = vpop.f32.mrb[9].mxu0  ;;  %3535 = vst [vmem:[#allocation15_spill] sm:$0xff] %v2917_v58  ;;  %v2923_v9 = vadd.f32 %v2004_v63, %v2889_v56  ;;  %v275_v14 = vpop.f32.mrb[7].mxu1 }
 0x120   :  { %v2910_v44 = vadd.f32 %v205_v43, %v92_v49  ;;  %v207_v45 = vpop.f32.mrb[10].mxu0  ;;  %3536 = vst [vmem:[#allocation16_spill] sm:$0xff] %v2920_v62  ;;  %v2926_v41 = vadd.f32 %v275_v14, %v2889_v56 }
 0x121   :  { %3531 = vst [vmem:[#allocation11_spill] sm:$0xff] %v2908_v42  ;;  %v2912_v50 = vadd.f32 %v207_v45, %v88_v47  ;;  %v209_v52 = vpop.f32.mrb[11].mxu0  ;;  %3537 = vst [vmem:[#allocation17_spill] sm:$0xff] %v2923_v9 }
 0x122   :  { %3532 = vst [vmem:[#allocation12_spill] sm:$0xff] %v2910_v44  ;;  %v2914_v55 = vadd.f32 %v209_v52, %v92_v49  ;;  %3538 = vst [vmem:[#allocation18_spill] sm:$0xff] %v2926_v41 }
 0x123   :  { %3533 = vst [vmem:[#allocation13_spill] sm:$0xff] %v2912_v50  ;;  %v186_v50 = vadd.f32 %v185_v48, %v92_v49 }
 0x124   :  { %3534 = vst [vmem:[#allocation14_spill] sm:$0xff] %v2914_v55  ;;  %v184_v55 = vadd.f32 %v183_v46, %v88_v47  ;;  %v2939_v46 = vld [vmem:[%s3521_s5] ss:$0 sm:$0xff] }
 0x126   :  { %v213_v43 = vpop.f32.mrb[12].mxu0 }
 0x127   :  { %v2928_v45 = vadd.f32 %v213_v43, %v88_v47  ;;  %v215_v52 = vpop.f32.mrb[13].mxu0 }
 0x128   :  { %v2930_v0 = vadd.f32 %v215_v52, %v92_v49  ;;  %v217_v54 = vpop.f32.mrb[14].mxu0 }
 0x129   :  { %3539 = vst [vmem:[#allocation19_spill] sm:$0xff] %v2928_v45  ;;  %v2932_v16 = vadd.f32 %v217_v54, %v88_v47  ;;  %v219_v58 = vpop.f32.mrb[15].mxu0 }
 0x12a   :  { %3540 = vst [vmem:[#allocation20_spill] sm:$0xff] %v2930_v0  ;;  %v2934_v60 = vadd.f32 %v219_v58, %v92_v49 }
 0x12b   :  { %3541 = vst [vmem:[#allocation21_spill] sm:$0xff] %v2932_v16 }
 0x12e   :  { %v493_v63 = vpop.f32.mrb[16].mxu0 }
 0x12f   :  { %v500_v9 = vadd.f32 %v493_v63, %v184_v55  ;;  %v495_v62 = vpop.f32.mrb[17].mxu0 }
 0x130   :  { %v507_v44 = vadd.f32 %v495_v62, %v186_v50  ;;  %v497_v14 = vpop.f32.mrb[18].mxu0 }
 0x131   :  { %v1807_v41 = vmul.f32 -1.442695, %v500_v9  ;;  %v498_v42 = vpop.f32.mrb[19].mxu0 }
 0x132   :  { %v1808_v43 = vmul.f32 -1.442695, %v507_v44  ;;  %v257_v42 = vadd.f32 %v256_v3, %v2889_v56  ;;  %v3543_v56 = vmov 0   ;;  %v3003_v3 = vld [vmem:[%s3523_s7] ss:$0 sm:$0xff] }
 0x133   :  { %2381 = vpow2.f32 %v1807_v41 }
 0x134   :  { %v596_v45 = vpop.f32.mrb[8].mxu1  ;;  %2383 = vpow2.f32 %v1808_v43 }
 0x135   :  { %v2023_v52 = vpop.f32.mrb[9].mxu1  ;;  %v597_v48 = vadd.f32 %v2939_v46, %v596_v45  ;;  %v3542_v45 = vmov 0.0  }
 0x136   :  { %v599_v0 = vpop.f32.mrb[10].mxu1 }
 0x137   :  { %v2024_v54 = vpop.f32.mrb[11].mxu1 }
 0x13d   :  { %v2382_v16 = vpop.eup %2381 }
 0x13e   :  { %v504_v11 = vadd.f32 1.0, %v2382_v16  ;;  %v2384_v58 = vpop.eup %2383 }
 0x13f   :  { %v511_v47 = vadd.f32 1.0, %v2384_v58 }
 0x140   :  { %2385 = vrcp.f32 %v504_v11 }
 0x141   :  { %2387 = vrcp.f32 %v511_v47 }
 0x14a   :  { %v2386_v49 = vpop.eup %2385 }
 0x14b   :  { %v602_v44 = vmul.f32 %v2386_v49, %v597_v48  ;;  %v2388_v0 = vpop.eup %2387 }
 0x14c   :  { %v605_v55 = vsub.f32 1.0, %v2388_v0  ;;  %v607_v62 = vmul.f32 0.0, %v2388_v0 }
 0x14d   :  { %v603_v50 = vadd.f32 %v602_v44, %v257_v42 }
 0x14f   :  { %2389 = vtanh.f32 %v603_v50 }
 0x159   :  { %v2390_v16 = vpop.eup %2389 }
 0x15a   :  { %v606_v11 = vmul.f32 %v2390_v16, %v605_v55 }
 0x15c   :  { %v2943_v9 = vadd.f32 %v607_v62, %v606_v11 }
 0x15e   :  { %v609_v41 = vpack.c.bf16 %v2943_v9, %v2943_v9 }
 0x160   :  { %2042 = vmatmul.mubr.bf16.vlgmr.msra.gmra.mrb[20].mxu0 %v609_v41  ;;  %738 = vmatmul.mubr.bf16.vlgmr.msra.gmra.mrb[12].mxu1 %v609_v41 }
 0x161   :  { %2046 = vmatpush3.bf16.msra.mxu0 %v2743_v17  ;;  %2061 = vmatprep.mubr.msk.bf16.mxu0 %vm2572_vm1, %v3542_v45 }
 0x162   :  { %2047 = vmatprep.subr.bf16.mxu0 %v3542_v45  ;;  %2066 = vmatpush3.bf16.msra.mxu1 %v2853_v33 }
 0x163   :  { %2067 = vmatprep.subr.bf16.mxu1 %v3542_v45  ;;  %2081 = vmatprep.mubr.msk.bf16.mxu1 %vm2572_vm1, %v3542_v45 }
 0x165   :  { %2048 = vmatpush3.bf16.msra.mxu0 %v2747_v18 }
 0x166   :  { %2049 = vmatprep.subr.bf16.mxu0 %v3542_v45  ;;  %2068 = vmatpush3.bf16.msra.mxu1 %v2857_v34 }
 0x167   :  { %2069 = vmatprep.subr.bf16.mxu1 %v3542_v45 }
 0x169   :  { %2050 = vmatpush3.bf16.msra.mxu0 %v2770_v22 }
 0x16a   :  { %2051 = vmatprep.subr.bf16.mxu0 %v3542_v45  ;;  %2070 = vmatpush3.bf16.msra.mxu1 %v2861_v35 }
 0x16b   :  { %2071 = vmatprep.subr.bf16.mxu1 %v3542_v45 }
 0x16d   :  { %2052 = vmatpush3.bf16.msra.mxu0 %v2789_v26 }
 0x16e   :  { %2053 = vmatprep.subr.bf16.mxu0 %v3542_v45  ;;  %2072 = vmatpush3.bf16.msra.mxu1 %v2865_v36 }
 0x16f   :  { %2073 = vmatprep.subr.bf16.mxu1 %v3542_v45 }
 0x171   :  { %2054 = vmatpush3.bf16.msra.mxu0 %v2805_v28 }
 0x172   :  { %2055 = vmatprep.subr.bf16.mxu0 %v3542_v45  ;;  %2074 = vmatpush3.bf16.msra.mxu1 %v2869_v37 }
 0x173   :  { %2075 = vmatprep.subr.bf16.mxu1 %v3542_v45 }
 0x175   :  { %2056 = vmatpush3.bf16.msra.mxu0 %v2817_v30 }
 0x176   :  { %2057 = vmatprep.subr.bf16.mxu0 %v3542_v45  ;;  %2076 = vmatpush3.bf16.msra.mxu1 %v2872_v38 }
 0x177   :  { %2077 = vmatprep.subr.bf16.mxu1 %v3542_v45 }
 0x179   :  { %2058 = vmatpush3.bf16.msra.mxu0 %v2824_v31 }
 0x17a   :  { %2059 = vmatprep.subr.bf16.mxu0 %v3542_v45  ;;  %2078 = vmatpush3.bf16.msra.mxu1 %v2876_v39 }
 0x17b   :  { %2079 = vmatprep.subr.bf16.mxu1 %v3542_v45 }
 0x17d   :  { %2060 = vmatpush3.bf16.msra.mxu0 %v2830_v32 }
 0x17e   :  { %856 = vmatprep.subr.bf16.mxu0 %v2679_v4  ;;  %2080 = vmatpush3.bf16.msra.mxu1 %v2880_v40 }
 0x17f   :  { %2085 = vmatprep.subr.bf16.mxu1 %v3542_v45 }
 0x180   :  { %2062 = vmatmul.mubr.bf16.vlgmr.msra.gmra.mrb[24].mxu0 %v609_v41 }
 0x181   :  { %857 = vmatpush1.bf16.msra.mxu0 %v2684_v5  ;;  %888 = vmatprep.mubr.bf16.mxu0 %v3543_v56 }
 0x182   :  { %858 = vmatprep.subr.bf16.mxu0 %v2689_v6 }
 0x185   :  { %859 = vmatpush1.bf16.msra.mxu0 %v2698_v7 }
 0x186   :  { %860 = vmatprep.subr.bf16.mxu0 %v2705_v8 }
 0x189   :  { %861 = vmatpush1.bf16.msra.mxu0 %v2713_v10 }
 0x18a   :  { %862 = vmatprep.subr.bf16.mxu0 %v2723_v12 }
 0x18d   :  { %863 = vmatpush1.bf16.msra.mxu0 %v2729_v13 }
 0x18e   :  { %864 = vmatprep.subr.bf16.mxu0 %v2739_v15 }
 0x191   :  { %865 = vmatpush1.bf16.msra.mxu0 %v2754_v19 }
 0x192   :  { %866 = vmatprep.subr.bf16.mxu0 %v2761_v20 }
 0x195   :  { %867 = vmatpush1.bf16.msra.mxu0 %v2766_v21 }
 0x196   :  { %868 = vmatprep.subr.bf16.mxu0 %v2781_v24 }
 0x199   :  { %869 = vmatpush1.bf16.msra.mxu0 %v2787_v25 }
 0x19a   :  { %870 = vmatprep.subr.bf16.mxu0 %v2795_v27 }
 0x19d   :  { %871 = vmatpush1.bf16.msra.mxu0 %v2811_v29 }
 0x19e   :  { %2105 = vmatprep.subr.bf16.mxu0 %v3542_v45 }
 0x233   :  { %v692_v63 = vpop.f32.mrb[20].mxu0  ;;  %v739_v14 = vpop.f32.mrb[12].mxu1 }
 0x234   :  { %v693_v43 = vadd.f32 %v3003_v3, %v692_v63  ;;  %v746_v52 = vadd.f32 %v739_v14, %v2885_v51  ;;  %v2043_v54 = vpop.f32.mrb[21].mxu0  ;;  %v741_v58 = vpop.f32.mrb[13].mxu1 }
 0x235   :  { %v753_v47 = vadd.f32 %v741_v58, %v2887_v53  ;;  %v695_v48 = vpop.f32.mrb[22].mxu0  ;;  %v743_v49 = vpop.f32.mrb[14].mxu1 }
 0x236   :  { %698 = vst [vmem:[%s3524_s8] sm:$0xff] %v693_v43  ;;  %v1825_v42 = vmul.f32 -1.442695, %v746_v52  ;;  %v2044_v44 = vpop.f32.mrb[23].mxu0  ;;  %v744_v50 = vpop.f32.mrb[15].mxu1 }
 0x237   :  { %v1826_v0 = vmul.f32 -1.442695, %v753_v47 }
 0x238   :  { %2391 = vpow2.f32 %v1825_v42 }
 0x239   :  { %2393 = vpow2.f32 %v1826_v0 }
 0x242   :  { %v2392_v55 = vpop.eup %2391 }
 0x243   :  { %v750_v16 = vadd.f32 1.0, %v2392_v55  ;;  %v2394_v51 = vpop.eup %2393 }
 0x244   :  { %v757_v11 = vadd.f32 1.0, %v2394_v51 }
 0x245   :  { %2395 = vrcp.f32 %v750_v16 }
 0x246   :  { %2397 = vrcp.f32 %v757_v11 }
 0x24f   :  { %v2396_v63 = vpop.eup %2395 }
 0x250   :  { %v2398_v58 = vpop.eup %2397 }
 0x251   :  { %v803_v47 = vsub.f32 1.0, %v2398_v58  ;;  %v805_v42 = vmul.f32 %v2398_v58, %v2943_v9 }
 0x253   :  { %v794_v62 = vpop.f32.mrb[24].mxu0 }
 0x254   :  { %v795_v53 = vadd.f32 %v2939_v46, %v794_v62  ;;  %v2063_v41 = vpop.f32.mrb[25].mxu0 }
 0x255   :  { %v797_v14 = vpop.f32.mrb[26].mxu0 }
 0x256   :  { %v800_v54 = vmul.f32 %v2396_v63, %v795_v53  ;;  %v2064_v43 = vpop.f32.mrb[27].mxu0 }
 0x258   :  { %v801_v52 = vadd.f32 %v800_v54, %v2906_v23 }
 0x25a   :  { %2399 = vtanh.f32 %v801_v52 }
 0x264   :  { %v2400_v48 = vpop.eup %2399 }
 0x265   :  { %v804_v49 = vmul.f32 %v2400_v48, %v803_v47 }
 0x267   :  { %v3014_v44 = vadd.f32 %v805_v42, %v804_v49 }
 0x269   :  { %v807_v50 = vpack.c.bf16 %v3014_v44, %v3014_v44 }
 0x26b   :  { %2082 = vmatmul.mubr.bf16.vlgmr.msra.gmra.mrb[16].mxu1 %v807_v50  ;;  %889 = vmatmul.mubr.bf16.vlgmr.msra.gmra.mrb[28].mxu0 %v807_v50 }
 0x26c   :  { %2086 = vmatpush3.bf16.msra.mxu1 %v2743_v17  ;;  %2101 = vmatprep.mubr.msk.bf16.mxu1 %vm2572_vm1, %v3542_v45 }
 0x26d   :  { %2087 = vmatprep.subr.bf16.mxu1 %v3542_v45  ;;  %2106 = vmatpush3.bf16.msra.mxu0 %v2853_v33 }
 0x26e   :  { %2107 = vmatprep.subr.bf16.mxu0 %v3542_v45  ;;  %2121 = vmatprep.mubr.msk.bf16.mxu0 %vm2572_vm1, %v3542_v45 }
 0x270   :  { %2088 = vmatpush3.bf16.msra.mxu1 %v2747_v18 }
 0x271   :  { %2089 = vmatprep.subr.bf16.mxu1 %v3542_v45  ;;  %2108 = vmatpush3.bf16.msra.mxu0 %v2857_v34 }
 0x272   :  { %2109 = vmatprep.subr.bf16.mxu0 %v3542_v45 }
 0x274   :  { %2090 = vmatpush3.bf16.msra.mxu1 %v2770_v22 }
 0x275   :  { %2091 = vmatprep.subr.bf16.mxu1 %v3542_v45  ;;  %2110 = vmatpush3.bf16.msra.mxu0 %v2861_v35 }
 0x276   :  { %2111 = vmatprep.subr.bf16.mxu0 %v3542_v45 }
 0x278   :  { %2092 = vmatpush3.bf16.msra.mxu1 %v2789_v26 }
 0x279   :  { %2093 = vmatprep.subr.bf16.mxu1 %v3542_v45  ;;  %2112 = vmatpush3.bf16.msra.mxu0 %v2865_v36 }
 0x27a   :  { %2113 = vmatprep.subr.bf16.mxu0 %v3542_v45 }
 0x27c   :  { %2094 = vmatpush3.bf16.msra.mxu1 %v2805_v28 }
 0x27d   :  { %2095 = vmatprep.subr.bf16.mxu1 %v3542_v45  ;;  %2114 = vmatpush3.bf16.msra.mxu0 %v2869_v37 }
 0x27e   :  { %2115 = vmatprep.subr.bf16.mxu0 %v3542_v45 }
 0x280   :  { %2096 = vmatpush3.bf16.msra.mxu1 %v2817_v30 }
 0x281   :  { %2097 = vmatprep.subr.bf16.mxu1 %v3542_v45  ;;  %2116 = vmatpush3.bf16.msra.mxu0 %v2872_v38 }
 0x282   :  { %2117 = vmatprep.subr.bf16.mxu0 %v3542_v45 }
 0x284   :  { %2098 = vmatpush3.bf16.msra.mxu1 %v2824_v31 }
 0x285   :  { %2099 = vmatprep.subr.bf16.mxu1 %v3542_v45  ;;  %2118 = vmatpush3.bf16.msra.mxu0 %v2876_v39 }
 0x286   :  { %2119 = vmatprep.subr.bf16.mxu0 %v3542_v45 }
 0x288   :  { %2100 = vmatpush3.bf16.msra.mxu1 %v2830_v32 }
 0x289   :  { %1007 = vmatprep.subr.bf16.mxu1 %v2679_v4  ;;  %2120 = vmatpush3.bf16.msra.mxu0 %v2880_v40 }
 0x28a   :  { %2125 = vmatprep.subr.bf16.mxu0 %v3542_v45 }
 0x28b   :  { %2102 = vmatmul.mubr.bf16.vlgmr.msra.gmra.mrb[20].mxu1 %v807_v50 }
 0x28c   :  { %1008 = vmatpush1.bf16.msra.mxu1 %v2684_v5  ;;  %1039 = vmatprep.mubr.bf16.mxu1 %v3543_v56 }
 0x28d   :  { %1009 = vmatprep.subr.bf16.mxu1 %v2689_v6 }
 0x290   :  { %1010 = vmatpush1.bf16.msra.mxu1 %v2698_v7 }
 0x291   :  { %1011 = vmatprep.subr.bf16.mxu1 %v2705_v8 }
 0x294   :  { %1012 = vmatpush1.bf16.msra.mxu1 %v2713_v10 }
 0x295   :  { %1013 = vmatprep.subr.bf16.mxu1 %v2723_v12 }
 0x298   :  { %1014 = vmatpush1.bf16.msra.mxu1 %v2729_v13 }
 0x299   :  { %1015 = vmatprep.subr.bf16.mxu1 %v2739_v15 }
 0x29c   :  { %1016 = vmatpush1.bf16.msra.mxu1 %v2754_v19 }
 0x29d   :  { %1017 = vmatprep.subr.bf16.mxu1 %v2761_v20 }
 0x2a0   :  { %1018 = vmatpush1.bf16.msra.mxu1 %v2766_v21 }
 0x2a1   :  { %1019 = vmatprep.subr.bf16.mxu1 %v2781_v24 }
 0x2a4   :  { %1020 = vmatpush1.bf16.msra.mxu1 %v2787_v25 }
 0x2a5   :  { %1021 = vmatprep.subr.bf16.mxu1 %v2795_v27 }
 0x2a8   :  { %1022 = vmatpush1.bf16.msra.mxu1 %v2811_v29 }
 0x2a9   :  { %2145 = vmatprep.subr.bf16.mxu1 %v3542_v45 }
 0x33e   :  { %v842_v23 = vpop.f32.mrb[16].mxu1  ;;  %v890_v9 = vpop.f32.mrb[28].mxu0 }
 0x33f   :  { %v843_v0 = vadd.f32 %v3003_v3, %v842_v23  ;;  %v897_v55 = vadd.f32 %v890_v9, %v2891_v57  ;;  %v2083_v16 = vpop.f32.mrb[17].mxu1  ;;  %v892_v51 = vpop.f32.mrb[29].mxu0 }
 0x340   :  { %v904_v11 = vadd.f32 %v892_v51, %v2893_v59  ;;  %v845_v62 = vpop.f32.mrb[18].mxu1  ;;  %v894_v53 = vpop.f32.mrb[30].mxu0 }
 0x341   :  { %1827 = vst [vmem:[%s3524_s8 + $0x8] sm:$0xff] %v843_v0  ;;  %v1828_v41 = vmul.f32 -1.442695, %v897_v55  ;;  %v2084_v63 = vpop.f32.mrb[19].mxu1  ;;  %v895_v14 = vpop.f32.mrb[31].mxu0 }
 0x342   :  { %v1829_v54 = vmul.f32 -1.442695, %v904_v11 }
 0x343   :  { %2401 = vpow2.f32 %v1828_v41 }
 0x344   :  { %2403 = vpow2.f32 %v1829_v54 }
 0x34d   :  { %v2402_v43 = vpop.eup %2401 }
 0x34e   :  { %v901_v52 = vadd.f32 1.0, %v2402_v43  ;;  %v2404_v57 = vpop.eup %2403 }
 0x34f   :  { %v908_v58 = vadd.f32 1.0, %v2404_v57 }
 0x350   :  { %2405 = vrcp.f32 %v901_v52 }
 0x351   :  { %2407 = vrcp.f32 %v908_v58 }
 0x35a   :  { %v2406_v49 = vpop.eup %2405 }
 0x35b   :  { %v2408_v0 = vpop.eup %2407 }
 0x35c   :  { %v954_v55 = vsub.f32 1.0, %v2408_v0  ;;  %v956_v11 = vmul.f32 %v2408_v0, %v3014_v44 }
 0x35e   :  { %v945_v47 = vpop.f32.mrb[20].mxu1 }
 0x35f   :  { %v946_v59 = vadd.f32 %v2939_v46, %v945_v47  ;;  %v2103_v48 = vpop.f32.mrb[21].mxu1  ;;  %v3544_v47 = vld [vmem:[#allocation10_spill] sm:$0xff] }
 0x360   :  { %v948_v42 = vpop.f32.mrb[22].mxu1 }
 0x361   :  { %v951_v50 = vmul.f32 %v2406_v49, %v946_v59  ;;  %v2104_v23 = vpop.f32.mrb[23].mxu1 }
 0x363   :  { %v952_v9 = vadd.f32 %v951_v50, %v2900_v2 }
 0x365   :  { %2409 = vtanh.f32 %v952_v9 }
 0x36f   :  { %v2410_v16 = vpop.eup %2409 }
 0x370   :  { %v955_v51 = vmul.f32 %v2410_v16, %v954_v55  ;;  %v3237_v55 = vld [vmem:[%s3518_s2 + $0x44] ss:$8 sps:$4 sm:$0xff]   ;;  %v3243_v16 = vld [vmem:[%s3518_s2 + $0x40] ss:$8 sps:$4 sm:$0xff]  }
 0x372   :  { %v3080_v62 = vadd.f32 %v956_v11, %v955_v51  ;;  %v3249_v51 = vld [vmem:[%s3518_s2 + $0x54] ss:$8 sps:$4 sm:$0xff]   ;;  %v3255_v11 = vld [vmem:[%s3518_s2 + $0x50] ss:$8 sps:$4 sm:$0xff]  }
 0x374   :  { %v958_v53 = vpack.c.bf16 %v3080_v62, %v3080_v62 }
 0x376   :  { %2122 = vmatmul.mubr.bf16.vlgmr.msra.gmra.mrb[32].mxu0 %v958_v53  ;;  %1040 = vmatmul.mubr.bf16.vlgmr.msra.gmra.mrb[24].mxu1 %v958_v53 }
 0x377   :  { %2126 = vmatpush3.bf16.msra.mxu0 %v2743_v17  ;;  %2141 = vmatprep.mubr.msk.bf16.mxu0 %vm2572_vm1, %v3542_v45 }
 0x378   :  { %2127 = vmatprep.subr.bf16.mxu0 %v3542_v45  ;;  %2146 = vmatpush3.bf16.msra.mxu1 %v2853_v33 }
 0x379   :  { %2147 = vmatprep.subr.bf16.mxu1 %v3542_v45  ;;  %2161 = vmatprep.mubr.msk.bf16.mxu1 %vm2572_vm1, %v3542_v45 }
 0x37b   :  { %2128 = vmatpush3.bf16.msra.mxu0 %v2747_v18 }
 0x37c   :  { %2129 = vmatprep.subr.bf16.mxu0 %v3542_v45  ;;  %2148 = vmatpush3.bf16.msra.mxu1 %v2857_v34 }
 0x37d   :  { %2149 = vmatprep.subr.bf16.mxu1 %v3542_v45 }
 0x37f   :  { %2130 = vmatpush3.bf16.msra.mxu0 %v2770_v22 }
 0x380   :  { %2131 = vmatprep.subr.bf16.mxu0 %v3542_v45  ;;  %2150 = vmatpush3.bf16.msra.mxu1 %v2861_v35 }
 0x381   :  { %2151 = vmatprep.subr.bf16.mxu1 %v3542_v45 }
 0x383   :  { %2132 = vmatpush3.bf16.msra.mxu0 %v2789_v26 }
 0x384   :  { %2133 = vmatprep.subr.bf16.mxu0 %v3542_v45  ;;  %2152 = vmatpush3.bf16.msra.mxu1 %v2865_v36 }
 0x385   :  { %2153 = vmatprep.subr.bf16.mxu1 %v3542_v45 }
 0x387   :  { %2134 = vmatpush3.bf16.msra.mxu0 %v2805_v28 }
 0x388   :  { %2135 = vmatprep.subr.bf16.mxu0 %v3542_v45  ;;  %2154 = vmatpush3.bf16.msra.mxu1 %v2869_v37 }
 0x389   :  { %2155 = vmatprep.subr.bf16.mxu1 %v3542_v45 }
 0x38b   :  { %2136 = vmatpush3.bf16.msra.mxu0 %v2817_v30 }
 0x38c   :  { %2137 = vmatprep.subr.bf16.mxu0 %v3542_v45  ;;  %2156 = vmatpush3.bf16.msra.mxu1 %v2872_v38 }
 0x38d   :  { %2157 = vmatprep.subr.bf16.mxu1 %v3542_v45 }
 0x38f   :  { %2138 = vmatpush3.bf16.msra.mxu0 %v2824_v31 }
 0x390   :  { %2139 = vmatprep.subr.bf16.mxu0 %v3542_v45  ;;  %2158 = vmatpush3.bf16.msra.mxu1 %v2876_v39 }
 0x391   :  { %2159 = vmatprep.subr.bf16.mxu1 %v3542_v45 }
 0x393   :  { %2140 = vmatpush3.bf16.msra.mxu0 %v2830_v32 }
 0x394   :  { %1158 = vmatprep.subr.bf16.mxu0 %v2679_v4  ;;  %2160 = vmatpush3.bf16.msra.mxu1 %v2880_v40 }
 0x395   :  { %2165 = vmatprep.subr.bf16.mxu1 %v3542_v45 }
 0x396   :  { %2142 = vmatmul.mubr.bf16.vlgmr.msra.gmra.mrb[36].mxu0 %v958_v53 }
 0x397   :  { %1159 = vmatpush1.bf16.msra.mxu0 %v2684_v5  ;;  %1190 = vmatprep.mubr.bf16.mxu0 %v3543_v56 }
 0x398   :  { %1160 = vmatprep.subr.bf16.mxu0 %v2689_v6 }
 0x39b   :  { %1161 = vmatpush1.bf16.msra.mxu0 %v2698_v7 }
 0x39c   :  { %1162 = vmatprep.subr.bf16.mxu0 %v2705_v8 }
 0x39f   :  { %1163 = vmatpush1.bf16.msra.mxu0 %v2713_v10 }
 0x3a0   :  { %1164 = vmatprep.subr.bf16.mxu0 %v2723_v12 }
 0x3a3   :  { %1165 = vmatpush1.bf16.msra.mxu0 %v2729_v13 }
 0x3a4   :  { %1166 = vmatprep.subr.bf16.mxu0 %v2739_v15 }
 0x3a7   :  { %1167 = vmatpush1.bf16.msra.mxu0 %v2754_v19 }
 0x3a8   :  { %1168 = vmatprep.subr.bf16.mxu0 %v2761_v20 }
 0x3ab   :  { %1169 = vmatpush1.bf16.msra.mxu0 %v2766_v21 }
 0x3ac   :  { %1170 = vmatprep.subr.bf16.mxu0 %v2781_v24 }
 0x3af   :  { %1171 = vmatpush1.bf16.msra.mxu0 %v2787_v25 }
 0x3b0   :  { %1172 = vmatprep.subr.bf16.mxu0 %v2795_v27 }
 0x3b3   :  { %1173 = vmatpush1.bf16.msra.mxu0 %v2811_v29 }
 0x3b4   :  { %2185 = vmatprep.subr.bf16.mxu0 %v3542_v45 }
 0x449   :  { %v993_v4 = vpop.f32.mrb[32].mxu0  ;;  %v1041_v5 = vpop.f32.mrb[24].mxu1 }
 0x44a   :  { %v994_v6 = vadd.f32 %v3003_v3, %v993_v4  ;;  %v1048_v7 = vadd.f32 %v1041_v5, %v2895_v61  ;;  %v2123_v8 = vpop.f32.mrb[33].mxu0  ;;  %v1043_v10 = vpop.f32.mrb[25].mxu1  ;;  %v3545_v5 = vld [vmem:[#allocation11_spill] sm:$0xff] }
 0x44b   :  { %v1055_v12 = vadd.f32 %v1043_v10, %v2897_v1  ;;  %v996_v13 = vpop.f32.mrb[34].mxu0  ;;  %v1045_v15 = vpop.f32.mrb[26].mxu1  ;;  %v3546_v10 = vld [vmem:[#allocation12_spill] sm:$0xff] }
 0x44c   :  { %1830 = vst [vmem:[%s3524_s8 + $0x10] sm:$0xff] %v994_v6  ;;  %v1831_v19 = vmul.f32 -1.442695, %v1048_v7  ;;  %v2124_v20 = vpop.f32.mrb[35].mxu0  ;;  %v1046_v21 = vpop.f32.mrb[27].mxu1 }
 0x44d   :  { %v1832_v2 = vmul.f32 -1.442695, %v1055_v12 }
 0x44e   :  { %2411 = vpow2.f32 %v1831_v19 }
 0x44f   :  { %2413 = vpow2.f32 %v1832_v2 }
 0x458   :  { %v2412_v44 = vpop.eup %2411 }
 0x459   :  { %v1052_v41 = vadd.f32 1.0, %v2412_v44  ;;  %v2414_v61 = vpop.eup %2413 }
 0x45a   :  { %v1059_v63 = vadd.f32 1.0, %v2414_v61 }
 0x45b   :  { %2415 = vrcp.f32 %v1052_v41 }
 0x45c   :  { %2417 = vrcp.f32 %v1059_v63 }
 0x465   :  { %v2416_v43 = vpop.eup %2415 }
 0x466   :  { %v2418_v48 = vpop.eup %2417 }
 0x467   :  { %v1105_v49 = vsub.f32 1.0, %v2418_v48  ;;  %v1107_v23 = vmul.f32 %v2418_v48, %v3080_v62 }
 0x469   :  { %v1096_v14 = vpop.f32.mrb[36].mxu0 }
 0x46a   :  { %v1097_v1 = vadd.f32 %v2939_v46, %v1096_v14  ;;  %v2143_v54 = vpop.f32.mrb[37].mxu0 }
 0x46b   :  { %v1099_v52 = vpop.f32.mrb[38].mxu0 }
 0x46c   :  { %v1102_v57 = vmul.f32 %v2416_v43, %v1097_v1  ;;  %v2144_v58 = vpop.f32.mrb[39].mxu0  ;;  %v3547_v43 = vld [vmem:[#allocation16_spill] sm:$0xff] }
 0x46e   :  { %v1103_v59 = vadd.f32 %v1102_v57, %v3544_v47 }
 0x470   :  { %2419 = vtanh.f32 %v1103_v59 }
 0x47a   :  { %v2420_v42 = vpop.eup %2419 }
 0x47b   :  { %v1106_v50 = vmul.f32 %v2420_v42, %v1105_v49 }
 0x47d   :  { %v3146_v9 = vadd.f32 %v1107_v23, %v1106_v50  ;;  %v3276_v50 = vld [vmem:[#allocation3] sm:$0xff]   ;;  %v3286_v23 = vld [vmem:[#allocation3 + $0x8] sm:$0xff]  }
 0x47f   :  { %v1109_v0 = vpack.c.bf16 %v3146_v9, %v3146_v9 }
 0x481   :  { %2162 = vmatmul.mubr.bf16.vlgmr.msra.gmra.mrb[28].mxu1 %v1109_v0  ;;  %1191 = vmatmul.mubr.bf16.vlgmr.msra.gmra.mrb[40].mxu0 %v1109_v0 }
 0x482   :  { %2166 = vmatpush3.bf16.msra.mxu1 %v2743_v17  ;;  %2181 = vmatprep.mubr.msk.bf16.mxu1 %vm2572_vm1, %v3542_v45  ;;  %v3186_v17 = vld [vmem:[%s3518_s2 + $0x4] ss:$8 sps:$4 sm:$0xff]  }
 0x483   :  { %2167 = vmatprep.subr.bf16.mxu1 %v3542_v45  ;;  %2186 = vmatpush3.bf16.msra.mxu0 %v2853_v33 }
 0x484   :  { %2187 = vmatprep.subr.bf16.mxu0 %v3542_v45  ;;  %2201 = vmatprep.mubr.msk.bf16.mxu0 %vm2572_vm1, %v3542_v45 }
 0x486   :  { %2168 = vmatpush3.bf16.msra.mxu1 %v2747_v18  ;;  %v3194_v18 = vld [vmem:[%s3518_s2] ss:$8 sps:$4 sm:$0xff]  }
 0x487   :  { %2169 = vmatprep.subr.bf16.mxu1 %v3542_v45  ;;  %2188 = vmatpush3.bf16.msra.mxu0 %v2857_v34 }
 0x488   :  { %2189 = vmatprep.subr.bf16.mxu0 %v3542_v45 }
 0x48a   :  { %2170 = vmatpush3.bf16.msra.mxu1 %v2770_v22  ;;  %v3201_v22 = vld [vmem:[%s3518_s2 + $0x14] ss:$8 sps:$4 sm:$0xff]  }
 0x48b   :  { %2171 = vmatprep.subr.bf16.mxu1 %v3542_v45  ;;  %2190 = vmatpush3.bf16.msra.mxu0 %v2861_v35 }
 0x48c   :  { %2191 = vmatprep.subr.bf16.mxu0 %v3542_v45 }
 0x48e   :  { %2172 = vmatpush3.bf16.msra.mxu1 %v2789_v26  ;;  %v3207_v26 = vld [vmem:[%s3518_s2 + $0x10] ss:$8 sps:$4 sm:$0xff]  }
 0x48f   :  { %2173 = vmatprep.subr.bf16.mxu1 %v3542_v45  ;;  %2192 = vmatpush3.bf16.msra.mxu0 %v2865_v36 }
 0x490   :  { %2193 = vmatprep.subr.bf16.mxu0 %v3542_v45 }
 0x492   :  { %2174 = vmatpush3.bf16.msra.mxu1 %v2805_v28  ;;  %v3213_v28 = vld [vmem:[%s3518_s2 + $0x24] ss:$8 sps:$4 sm:$0xff]  }
 0x493   :  { %2175 = vmatprep.subr.bf16.mxu1 %v3542_v45  ;;  %2194 = vmatpush3.bf16.msra.mxu0 %v2869_v37 }
 0x494   :  { %2195 = vmatprep.subr.bf16.mxu0 %v3542_v45 }
 0x496   :  { %2176 = vmatpush3.bf16.msra.mxu1 %v2817_v30  ;;  %v3219_v30 = vld [vmem:[%s3518_s2 + $0x20] ss:$8 sps:$4 sm:$0xff]  }
 0x497   :  { %2177 = vmatprep.subr.bf16.mxu1 %v3542_v45  ;;  %2196 = vmatpush3.bf16.msra.mxu0 %v2872_v38 }
 0x498   :  { %2197 = vmatprep.subr.bf16.mxu0 %v3542_v45 }
 0x49a   :  { %2178 = vmatpush3.bf16.msra.mxu1 %v2824_v31  ;;  %v3225_v31 = vld [vmem:[%s3518_s2 + $0x34] ss:$8 sps:$4 sm:$0xff]  }
 0x49b   :  { %2179 = vmatprep.subr.bf16.mxu1 %v3542_v45  ;;  %2198 = vmatpush3.bf16.msra.mxu0 %v2876_v39 }
 0x49c   :  { %2199 = vmatprep.subr.bf16.mxu0 %v3542_v45 }
 0x49e   :  { %2180 = vmatpush3.bf16.msra.mxu1 %v2830_v32  ;;  %v3231_v32 = vld [vmem:[%s3518_s2 + $0x30] ss:$8 sps:$4 sm:$0xff]  }
 0x49f   :  { %1309 = vmatprep.subr.bf16.mxu1 %v3186_v17  ;;  %2200 = vmatpush3.bf16.msra.mxu0 %v2880_v40 }
 0x4a0   :  { %2205 = vmatprep.subr.bf16.mxu0 %v3542_v45 }
 0x4a1   :  { %2182 = vmatmul.mubr.bf16.vlgmr.msra.gmra.mrb[32].mxu1 %v1109_v0  ;;  %v3361_v0 = vld [vmem:[%s3518_s2 + $0x70] ss:$8 sps:$4 sm:$0xff]  }
 0x4a2   :  { %1310 = vmatpush1.bf16.msra.mxu1 %v3194_v18  ;;  %1341 = vmatprep.mubr.bf16.mxu1 %v3543_v56 }
 0x4a3   :  { %1311 = vmatprep.subr.bf16.mxu1 %v3201_v22 }
 0x4a6   :  { %1312 = vmatpush1.bf16.msra.mxu1 %v3207_v26 }
 0x4a7   :  { %1313 = vmatprep.subr.bf16.mxu1 %v3213_v28 }
 0x4aa   :  { %1314 = vmatpush1.bf16.msra.mxu1 %v3219_v30 }
 0x4ab   :  { %1315 = vmatprep.subr.bf16.mxu1 %v3225_v31 }
 0x4ae   :  { %1316 = vmatpush1.bf16.msra.mxu1 %v3231_v32 }
 0x4af   :  { %1317 = vmatprep.subr.bf16.mxu1 %v3237_v55 }
 0x4b2   :  { %1318 = vmatpush1.bf16.msra.mxu1 %v3243_v16 }
 0x4b3   :  { %1319 = vmatprep.subr.bf16.mxu1 %v3249_v51 }
 0x4b6   :  { %1320 = vmatpush1.bf16.msra.mxu1 %v3255_v11 }
 0x4b7   :  { %1321 = vmatprep.subr.bf16.mxu1 %v2781_v24 }
 0x4ba   :  { %1322 = vmatpush1.bf16.msra.mxu1 %v2787_v25 }
 0x4bb   :  { %1323 = vmatprep.subr.bf16.mxu1 %v2795_v27 }
 0x4be   :  { %1324 = vmatpush1.bf16.msra.mxu1 %v2811_v29 }
 0x4bf   :  { %2225 = vmatprep.subr.bf16.mxu1 %v3542_v45 }
 0x554   :  { %v1144_v62 = vpop.f32.mrb[28].mxu1  ;;  %v1192_v53 = vpop.f32.mrb[40].mxu0 }
 0x555   :  { %v1145_v4 = vadd.f32 %v3003_v3, %v1144_v62  ;;  %v1199_v6 = vadd.f32 %v1192_v53, %v3545_v5  ;;  %v2163_v7 = vpop.f32.mrb[29].mxu1  ;;  %v1194_v8 = vpop.f32.mrb[41].mxu0  ;;  %v3548_v5 = vld [vmem:[#allocation13_spill] sm:$0xff] }
 0x556   :  { %v1206_v12 = vadd.f32 %v1194_v8, %v3546_v10  ;;  %v1147_v13 = vpop.f32.mrb[30].mxu1  ;;  %v1196_v24 = vpop.f32.mrb[42].mxu0  ;;  %v3549_v10 = vld [vmem:[#allocation14_spill] sm:$0xff] }
 0x557   :  { %1833 = vst [vmem:[%s3524_s8 + $0x18] sm:$0xff] %v1145_v4  ;;  %v1834_v25 = vmul.f32 -1.442695, %v1199_v6  ;;  %v2164_v27 = vpop.f32.mrb[31].mxu1  ;;  %v1197_v29 = vpop.f32.mrb[43].mxu0 }
 0x558   :  { %v1835_v15 = vmul.f32 -1.442695, %v1206_v12 }
 0x559   :  { %2421 = vpow2.f32 %v1834_v25 }
 0x55a   :  { %2423 = vpow2.f32 %v1835_v15 }
 0x563   :  { %v2422_v19 = vpop.eup %2421 }
 0x564   :  { %v1203_v20 = vadd.f32 1.0, %v2422_v19  ;;  %v2424_v21 = vpop.eup %2423 }
 0x565   :  { %v1210_v2 = vadd.f32 1.0, %v2424_v21 }
 0x566   :  { %2425 = vrcp.f32 %v1203_v20 }
 0x567   :  { %2427 = vrcp.f32 %v1210_v2 }
 0x570   :  { %v2426_v63 = vpop.eup %2425 }
 0x571   :  { %v2428_v57 = vpop.eup %2427 }
 0x572   :  { %v1256_v58 = vsub.f32 1.0, %v2428_v57  ;;  %v1258_v48 = vmul.f32 %v2428_v57, %v3146_v9  ;;  %v3292_v9 = vld [vmem:[#allocation3 + $0x10] sm:$0xff]  }
 0x574   :  { %v1247_v44 = vpop.f32.mrb[32].mxu1 }
 0x575   :  { %v1248_v41 = vadd.f32 %v2939_v46, %v1247_v44  ;;  %v2183_v61 = vpop.f32.mrb[33].mxu1 }
 0x576   :  { %v1250_v14 = vpop.f32.mrb[34].mxu1 }
 0x577   :  { %v1253_v1 = vmul.f32 %v2426_v63, %v1248_v41  ;;  %v2184_v54 = vpop.f32.mrb[35].mxu1 }
 0x579   :  { %v1254_v52 = vadd.f32 %v1253_v1, %v3547_v43  ;;  %v3550_v43 = vld [vmem:[#allocation18_spill] sm:$0xff] }
 0x57b   :  { %2429 = vtanh.f32 %v1254_v52 }
 0x585   :  { %v2430_v47 = vpop.eup %2429 }
 0x586   :  { %v1257_v59 = vmul.f32 %v2430_v47, %v1256_v58 }
 0x588   :  { %v3272_v49 = vadd.f32 %v1258_v48, %v1257_v59 }
 0x58a   :  { %v1260_v42 = vpack.c.bf16 %v3272_v49, %v3272_v49 }
 0x58c   :  { %2202 = vmatmul.mubr.bf16.vlgmr.msra.gmra.mrb[44].mxu0 %v1260_v42  ;;  %1342 = vmatmul.mubr.bf16.vlgmr.msra.gmra.mrb[36].mxu1 %v1260_v42 }
 0x58d   :  { %2206 = vmatpush3.bf16.msra.mxu0 %v3276_v50  ;;  %2221 = vmatprep.mubr.msk.bf16.mxu0 %vm2572_vm1, %v3542_v45 }
 0x58e   :  { %2207 = vmatprep.subr.bf16.mxu0 %v3542_v45  ;;  %2226 = vmatpush3.bf16.msra.mxu1 %v2853_v33  ;;  %v3298_v33 = vld [vmem:[#allocation3 + $0x18] sm:$0xff]  }
 0x58f   :  { %2227 = vmatprep.subr.bf16.mxu1 %v3542_v45  ;;  %2241 = vmatprep.mubr.msk.bf16.mxu1 %vm2572_vm1, %v3542_v45 }
 0x591   :  { %2208 = vmatpush3.bf16.msra.mxu0 %v3286_v23 }
 0x592   :  { %2209 = vmatprep.subr.bf16.mxu0 %v3542_v45  ;;  %2228 = vmatpush3.bf16.msra.mxu1 %v2857_v34  ;;  %v3304_v34 = vld [vmem:[#allocation3 + $0x20] sm:$0xff]  }
 0x593   :  { %2229 = vmatprep.subr.bf16.mxu1 %v3542_v45 }
 0x595   :  { %2210 = vmatpush3.bf16.msra.mxu0 %v3292_v9 }
 0x596   :  { %2211 = vmatprep.subr.bf16.mxu0 %v3542_v45  ;;  %2230 = vmatpush3.bf16.msra.mxu1 %v2861_v35  ;;  %v3310_v35 = vld [vmem:[#allocation3 + $0x28] sm:$0xff]  }
 0x597   :  { %2231 = vmatprep.subr.bf16.mxu1 %v3542_v45 }
 0x599   :  { %2212 = vmatpush3.bf16.msra.mxu0 %v3298_v33 }
 0x59a   :  { %2213 = vmatprep.subr.bf16.mxu0 %v3542_v45  ;;  %2232 = vmatpush3.bf16.msra.mxu1 %v2865_v36  ;;  %v3316_v36 = vld [vmem:[#allocation3 + $0x30] sm:$0xff]  }
 0x59b   :  { %2233 = vmatprep.subr.bf16.mxu1 %v3542_v45 }
 0x59d   :  { %2214 = vmatpush3.bf16.msra.mxu0 %v3304_v34 }
 0x59e   :  { %2215 = vmatprep.subr.bf16.mxu0 %v3542_v45  ;;  %2234 = vmatpush3.bf16.msra.mxu1 %v2869_v37  ;;  %v3322_v37 = vld [vmem:[#allocation3 + $0x38] sm:$0xff]  }
 0x59f   :  { %2235 = vmatprep.subr.bf16.mxu1 %v3542_v45 }
 0x5a1   :  { %2216 = vmatpush3.bf16.msra.mxu0 %v3310_v35 }
 0x5a2   :  { %2217 = vmatprep.subr.bf16.mxu0 %v3542_v45  ;;  %2236 = vmatpush3.bf16.msra.mxu1 %v2872_v38  ;;  %v3343_v38 = vld [vmem:[%s3518_s2 + $0x64] ss:$8 sps:$4 sm:$0xff]  }
 0x5a3   :  { %2237 = vmatprep.subr.bf16.mxu1 %v3542_v45 }
 0x5a5   :  { %2218 = vmatpush3.bf16.msra.mxu0 %v3316_v36 }
 0x5a6   :  { %2219 = vmatprep.subr.bf16.mxu0 %v3542_v45  ;;  %2238 = vmatpush3.bf16.msra.mxu1 %v2876_v39  ;;  %v3349_v39 = vld [vmem:[%s3518_s2 + $0x60] ss:$8 sps:$4 sm:$0xff]  }
 0x5a7   :  { %2239 = vmatprep.subr.bf16.mxu1 %v3542_v45 }
 0x5a9   :  { %2220 = vmatpush3.bf16.msra.mxu0 %v3322_v37 }
 0x5aa   :  { %1460 = vmatprep.subr.bf16.mxu0 %v3186_v17  ;;  %2240 = vmatpush3.bf16.msra.mxu1 %v2880_v40  ;;  %v3355_v40 = vld [vmem:[%s3518_s2 + $0x74] ss:$8 sps:$4 sm:$0xff]  }
 0x5ab   :  { %2245 = vmatprep.subr.bf16.mxu1 %v3542_v45 }
 0x5ac   :  { %2222 = vmatmul.mubr.bf16.vlgmr.msra.gmra.mrb[48].mxu0 %v1260_v42 }
 0x5ad   :  { %1461 = vmatpush1.bf16.msra.mxu0 %v3194_v18  ;;  %1492 = vmatprep.mubr.bf16.mxu0 %v3543_v56 }
 0x5ae   :  { %1462 = vmatprep.subr.bf16.mxu0 %v3201_v22 }
 0x5b1   :  { %1463 = vmatpush1.bf16.msra.mxu0 %v3207_v26 }
 0x5b2   :  { %1464 = vmatprep.subr.bf16.mxu0 %v3213_v28 }
 0x5b5   :  { %1465 = vmatpush1.bf16.msra.mxu0 %v3219_v30 }
 0x5b6   :  { %1466 = vmatprep.subr.bf16.mxu0 %v3225_v31 }
 0x5b9   :  { %1467 = vmatpush1.bf16.msra.mxu0 %v3231_v32 }
 0x5ba   :  { %1468 = vmatprep.subr.bf16.mxu0 %v3237_v55 }
 0x5bd   :  { %1469 = vmatpush1.bf16.msra.mxu0 %v3243_v16 }
 0x5be   :  { %1470 = vmatprep.subr.bf16.mxu0 %v3249_v51 }
 0x5c1   :  { %1471 = vmatpush1.bf16.msra.mxu0 %v3255_v11 }
 0x5c2   :  { %1472 = vmatprep.subr.bf16.mxu0 %v3343_v38 }
 0x5c5   :  { %1473 = vmatpush1.bf16.msra.mxu0 %v3349_v39 }
 0x5c6   :  { %1474 = vmatprep.subr.bf16.mxu0 %v3355_v40 }
 0x5c9   :  { %1475 = vmatpush1.bf16.msra.mxu0 %v3361_v0 }
 0x5ca   :  { %2265 = vmatprep.subr.bf16.mxu0 %v3542_v45 }
 0x65f   :  { %v1295_v62 = vpop.f32.mrb[44].mxu0  ;;  %v1343_v53 = vpop.f32.mrb[36].mxu1 }
 0x660   :  { %v1296_v4 = vadd.f32 %v3003_v3, %v1295_v62  ;;  %v1350_v6 = vadd.f32 %v1343_v53, %v3548_v5  ;;  %v2203_v7 = vpop.f32.mrb[45].mxu0  ;;  %v1345_v8 = vpop.f32.mrb[37].mxu1  ;;  %v3382_v62 = vld [vmem:[#allocation7] sm:$0xff]   ;;  %v3396_v53 = vld [vmem:[#allocation7 + $0x10] sm:$0xff]  }
 0x661   :  { %v1357_v12 = vadd.f32 %v1345_v8, %v3549_v10  ;;  %v1298_v13 = vpop.f32.mrb[46].mxu0  ;;  %v1347_v24 = vpop.f32.mrb[38].mxu1  ;;  %v3408_v5 = vld [vmem:[#allocation7 + $0x20] sm:$0xff]   ;;  %v3420_v7 = vld [vmem:[#allocation7 + $0x30] sm:$0xff]   ;;  %v3426_v8 = vld [vmem:[#allocation7 + $0x38] sm:$0xff]  }
 0x662   :  { %1836 = vst [vmem:[%s3524_s8 + $0x20] sm:$0xff] %v1296_v4  ;;  %v1837_v25 = vmul.f32 -1.442695, %v1350_v6  ;;  %v2204_v27 = vpop.f32.mrb[47].mxu0  ;;  %v1348_v29 = vpop.f32.mrb[39].mxu1  ;;  %v3402_v4 = vld [vmem:[#allocation7 + $0x18] sm:$0xff]  }
 0x663   :  { %v1838_v15 = vmul.f32 -1.442695, %v1357_v12  ;;  %v3414_v6 = vld [vmem:[#allocation7 + $0x28] sm:$0xff]   ;;  %v3456_v13 = vld [vmem:[%s3521_s5] ss:$0 sm:$0xff] }
 0x664   :  { %2431 = vpow2.f32 %v1837_v25 }
 0x665   :  { %2433 = vpow2.f32 %v1838_v15 }
 0x66e   :  { %v2432_v19 = vpop.eup %2431 }
 0x66f   :  { %v1354_v20 = vadd.f32 1.0, %v2432_v19  ;;  %v2434_v21 = vpop.eup %2433 }
 0x670   :  { %v1361_v2 = vadd.f32 1.0, %v2434_v21 }
 0x671   :  { %2435 = vrcp.f32 %v1354_v20  ;;  %v3553_v20 = vld [vmem:[#allocation15_spill] sm:$0xff] }
 0x672   :  { %2437 = vrcp.f32 %v1361_v2 }
 0x67b   :  { %v2436_v63 = vpop.eup %2435 }
 0x67c   :  { %v2438_v57 = vpop.eup %2437 }
 0x67d   :  { %v1407_v58 = vsub.f32 1.0, %v2438_v57  ;;  %v1409_v48 = vmul.f32 %v2438_v57, %v3272_v49  ;;  %v3390_v49 = vld [vmem:[#allocation7 + $0x8] sm:$0xff]  }
 0x67f   :  { %v1398_v44 = vpop.f32.mrb[48].mxu0 }
 0x680   :  { %v1399_v41 = vadd.f32 %v2939_v46, %v1398_v44  ;;  %v2223_v61 = vpop.f32.mrb[49].mxu0 }
 0x681   :  { %v1401_v14 = vpop.f32.mrb[50].mxu0 }
 0x682   :  { %v1404_v1 = vmul.f32 %v2436_v63, %v1399_v41  ;;  %v2224_v54 = vpop.f32.mrb[51].mxu0 }
 0x684   :  { %v1405_v52 = vadd.f32 %v1404_v1, %v3550_v43 }
 0x686   :  { %2439 = vtanh.f32 %v1405_v52 }
 0x690   :  { %v2440_v47 = vpop.eup %2439 }
 0x691   :  { %v1408_v59 = vmul.f32 %v2440_v47, %v1407_v58 }
 0x693   :  { %v3374_v42 = vadd.f32 %v1409_v48, %v1408_v59 }
 0x695   :  { %v1411_v46 = vpack.c.bf16 %v3374_v42, %v3374_v42 }
 0x697   :  { %2242 = vmatmul.mubr.bf16.vlgmr.msra.gmra.mrb[40].mxu1 %v1411_v46  ;;  %1493 = vmatmul.mubr.bf16.vlgmr.msra.gmra.mrb[52].mxu0 %v1411_v46 }
 0x698   :  { %2246 = vmatpush3.bf16.msra.mxu1 %v3276_v50  ;;  %2261 = vmatprep.mubr.msk.bf16.mxu1 %vm2572_vm1, %v3542_v45 }
 0x699   :  { %2247 = vmatprep.subr.bf16.mxu1 %v3542_v45  ;;  %2266 = vmatpush3.bf16.msra.mxu0 %v3382_v62 }
 0x69a   :  { %2267 = vmatprep.subr.bf16.mxu0 %v3542_v45  ;;  %2281 = vmatprep.mubr.msk.bf16.mxu0 %vm2572_vm1, %v3542_v45 }
 0x69c   :  { %2248 = vmatpush3.bf16.msra.mxu1 %v3286_v23 }
 0x69d   :  { %2249 = vmatprep.subr.bf16.mxu1 %v3542_v45  ;;  %2268 = vmatpush3.bf16.msra.mxu0 %v3390_v49 }
 0x69e   :  { %2269 = vmatprep.subr.bf16.mxu0 %v3542_v45 }
 0x6a0   :  { %2250 = vmatpush3.bf16.msra.mxu1 %v3292_v9 }
 0x6a1   :  { %2251 = vmatprep.subr.bf16.mxu1 %v3542_v45  ;;  %2270 = vmatpush3.bf16.msra.mxu0 %v3396_v53 }
 0x6a2   :  { %2271 = vmatprep.subr.bf16.mxu0 %v3542_v45 }
 0x6a4   :  { %2252 = vmatpush3.bf16.msra.mxu1 %v3298_v33 }
 0x6a5   :  { %2253 = vmatprep.subr.bf16.mxu1 %v3542_v45  ;;  %2272 = vmatpush3.bf16.msra.mxu0 %v3402_v4 }
 0x6a6   :  { %2273 = vmatprep.subr.bf16.mxu0 %v3542_v45 }
 0x6a8   :  { %2254 = vmatpush3.bf16.msra.mxu1 %v3304_v34 }
 0x6a9   :  { %2255 = vmatprep.subr.bf16.mxu1 %v3542_v45  ;;  %2274 = vmatpush3.bf16.msra.mxu0 %v3408_v5 }
 0x6aa   :  { %2275 = vmatprep.subr.bf16.mxu0 %v3542_v45 }
 0x6ac   :  { %2256 = vmatpush3.bf16.msra.mxu1 %v3310_v35 }
 0x6ad   :  { %2257 = vmatprep.subr.bf16.mxu1 %v3542_v45  ;;  %2276 = vmatpush3.bf16.msra.mxu0 %v3414_v6 }
 0x6ae   :  { %2277 = vmatprep.subr.bf16.mxu0 %v3542_v45 }
 0x6b0   :  { %2258 = vmatpush3.bf16.msra.mxu1 %v3316_v36 }
 0x6b1   :  { %2259 = vmatprep.subr.bf16.mxu1 %v3542_v45  ;;  %2278 = vmatpush3.bf16.msra.mxu0 %v3420_v7 }
 0x6b2   :  { %2279 = vmatprep.subr.bf16.mxu0 %v3542_v45 }
 0x6b4   :  { %2260 = vmatpush3.bf16.msra.mxu1 %v3322_v37 }
 0x6b5   :  { %1611 = vmatprep.subr.bf16.mxu1 %v3186_v17  ;;  %2280 = vmatpush3.bf16.msra.mxu0 %v3426_v8 }
 0x6b6   :  { %2285 = vmatprep.subr.bf16.mxu0 %v3542_v45 }
 0x6b7   :  { %2262 = vmatmul.mubr.bf16.vlgmr.msra.gmra.mrb[44].mxu1 %v1411_v46 }
 0x6b8   :  { %1612 = vmatpush1.bf16.msra.mxu1 %v3194_v18  ;;  %1643 = vmatprep.mubr.bf16.mxu1 %v3543_v56 }
 0x6b9   :  { %1613 = vmatprep.subr.bf16.mxu1 %v3201_v22  ;;  %v3551_v22 = vld [vmem:[#allocation19_spill] sm:$0xff] }
 0x6bc   :  { %1614 = vmatpush1.bf16.msra.mxu1 %v3207_v26 }
 0x6bd   :  { %1615 = vmatprep.subr.bf16.mxu1 %v3213_v28 }
 0x6c0   :  { %1616 = vmatpush1.bf16.msra.mxu1 %v3219_v30 }
 0x6c1   :  { %1617 = vmatprep.subr.bf16.mxu1 %v3225_v31  ;;  %v3552_v31 = vld [vmem:[#allocation20_spill] sm:$0xff] }
 0x6c4   :  { %1618 = vmatpush1.bf16.msra.mxu1 %v3231_v32 }
 0x6c5   :  { %1619 = vmatprep.subr.bf16.mxu1 %v3237_v55 }
 0x6c8   :  { %1620 = vmatpush1.bf16.msra.mxu1 %v3243_v16 }
 0x6c9   :  { %1621 = vmatprep.subr.bf16.mxu1 %v3249_v51 }
 0x6cc   :  { %1622 = vmatpush1.bf16.msra.mxu1 %v3255_v11 }
 0x6cd   :  { %1623 = vmatprep.subr.bf16.mxu1 %v3343_v38 }
 0x6d0   :  { %1624 = vmatpush1.bf16.msra.mxu1 %v3349_v39 }
 0x6d1   :  { %1625 = vmatprep.subr.bf16.mxu1 %v3355_v40 }
 0x6d4   :  { %1626 = vmatpush1.bf16.msra.mxu1 %v3361_v0 }
 0x6d5   :  { %2305 = vmatprep.subr.bf16.mxu1 %v3542_v45 }
 0x76a   :  { %v1446_v56 = vpop.f32.mrb[40].mxu1  ;;  %v1494_v17 = vpop.f32.mrb[52].mxu0 }
 0x76b   :  { %v1447_v18 = vadd.f32 %v3003_v3, %v1446_v56  ;;  %v1501_v26 = vadd.f32 %v1494_v17, %v3551_v22  ;;  %v2243_v28 = vpop.f32.mrb[41].mxu1  ;;  %v1496_v30 = vpop.f32.mrb[53].mxu0 }
 0x76c   :  { %v1508_v32 = vadd.f32 %v1496_v30, %v3552_v31  ;;  %v1449_v55 = vpop.f32.mrb[42].mxu1  ;;  %v1498_v16 = vpop.f32.mrb[54].mxu0 }
 0x76d   :  { %1839 = vst [vmem:[%s3524_s8 + $0x28] sm:$0xff] %v1447_v18  ;;  %v1840_v51 = vmul.f32 -1.442695, %v1501_v26  ;;  %v2244_v11 = vpop.f32.mrb[43].mxu1  ;;  %v1499_v38 = vpop.f32.mrb[55].mxu0 }
 0x76e   :  { %v1841_v39 = vmul.f32 -1.442695, %v1508_v32 }
 0x76f   :  { %2441 = vpow2.f32 %v1840_v51 }
 0x770   :  { %2443 = vpow2.f32 %v1841_v39 }
 0x779   :  { %v2442_v40 = vpop.eup %2441 }
 0x77a   :  { %v1505_v3 = vadd.f32 1.0, %v2442_v40  ;;  %v2444_v0 = vpop.eup %2443 }
 0x77b   :  { %v1512_v10 = vadd.f32 1.0, %v2444_v0 }
 0x77c   :  { %2445 = vrcp.f32 %v1505_v3 }
 0x77d   :  { %2447 = vrcp.f32 %v1512_v10 }
 0x786   :  { %v2446_v27 = vpop.eup %2445 }
 0x787   :  { %v2448_v2 = vpop.eup %2447 }
 0x788   :  { %v1558_v44 = vsub.f32 1.0, %v2448_v2  ;;  %v1560_v63 = vmul.f32 %v2448_v2, %v3374_v42 }
 0x78a   :  { %v1549_v12 = vpop.f32.mrb[44].mxu1 }
 0x78b   :  { %v1550_v24 = vadd.f32 %v3456_v13, %v1549_v12  ;;  %v2263_v25 = vpop.f32.mrb[45].mxu1 }
 0x78c   :  { %v1552_v29 = vpop.f32.mrb[46].mxu1 }
 0x78d   :  { %v1555_v15 = vmul.f32 %v2446_v27, %v1550_v24  ;;  %v2264_v19 = vpop.f32.mrb[47].mxu1 }
 0x78f   :  { %v1556_v21 = vadd.f32 %v1555_v15, %v3553_v20 }
 0x791   :  { %2449 = vtanh.f32 %v1556_v21 }
 0x79b   :  { %v2450_v41 = vpop.eup %2449 }
 0x79c   :  { %v1559_v61 = vmul.f32 %v2450_v41, %v1558_v44 }
 0x79e   :  { %v3461_v14 = vadd.f32 %v1560_v63, %v1559_v61 }
 0x7a0   :  { %v1562_v1 = vpack.c.bf16 %v3461_v14, %v3461_v14 }
 0x7a2   :  { %2282 = vmatmul.mubr.bf16.vlgmr.msra.gmra.mrb[56].mxu0 %v1562_v1  ;;  %1644 = vmatmul.mubr.bf16.vlgmr.msra.gmra.mrb[48].mxu1 %v1562_v1 }
 0x7a3   :  { %2286 = vmatpush3.bf16.msra.mxu0 %v3276_v50  ;;  %2301 = vmatprep.mubr.msk.bf16.mxu0 %vm2572_vm1, %v3542_v45 }
 0x7a4   :  { %2287 = vmatprep.subr.bf16.mxu0 %v3542_v45  ;;  %2306 = vmatpush3.bf16.msra.mxu1 %v3382_v62 }
 0x7a5   :  { %2307 = vmatprep.subr.bf16.mxu1 %v3542_v45  ;;  %2321 = vmatprep.mubr.msk.bf16.mxu1 %vm2572_vm1, %v3542_v45 }
 0x7a7   :  { %2288 = vmatpush3.bf16.msra.mxu0 %v3286_v23 }
 0x7a8   :  { %2289 = vmatprep.subr.bf16.mxu0 %v3542_v45  ;;  %2308 = vmatpush3.bf16.msra.mxu1 %v3390_v49 }
 0x7a9   :  { %2309 = vmatprep.subr.bf16.mxu1 %v3542_v45 }
 0x7ab   :  { %2290 = vmatpush3.bf16.msra.mxu0 %v3292_v9  ;;  %v2494_v9 = vld [vmem:[%s3523_s7] ss:$0 sm:$0xff] }
 0x7ac   :  { %2291 = vmatprep.subr.bf16.mxu0 %v3542_v45  ;;  %2310 = vmatpush3.bf16.msra.mxu1 %v3396_v53 }
 0x7ad   :  { %2311 = vmatprep.subr.bf16.mxu1 %v3542_v45 }
 0x7af   :  { %2292 = vmatpush3.bf16.msra.mxu0 %v3298_v33 }
 0x7b0   :  { %2293 = vmatprep.subr.bf16.mxu0 %v3542_v45  ;;  %2312 = vmatpush3.bf16.msra.mxu1 %v3402_v4 }
 0x7b1   :  { %2313 = vmatprep.subr.bf16.mxu1 %v3542_v45 }
 0x7b3   :  { %2294 = vmatpush3.bf16.msra.mxu0 %v3304_v34  ;;  %v3554_v34 = vld [vmem:[#allocation21_spill] sm:$0xff] }
 0x7b4   :  { %2295 = vmatprep.subr.bf16.mxu0 %v3542_v45  ;;  %2314 = vmatpush3.bf16.msra.mxu1 %v3408_v5 }
 0x7b5   :  { %2315 = vmatprep.subr.bf16.mxu1 %v3542_v45 }
 0x7b7   :  { %2296 = vmatpush3.bf16.msra.mxu0 %v3310_v35 }
 0x7b8   :  { %2297 = vmatprep.subr.bf16.mxu0 %v3542_v45  ;;  %2316 = vmatpush3.bf16.msra.mxu1 %v3414_v6 }
 0x7b9   :  { %2317 = vmatprep.subr.bf16.mxu1 %v3542_v45 }
 0x7bb   :  { %2298 = vmatpush3.bf16.msra.mxu0 %v3316_v36 }
 0x7bc   :  { %2299 = vmatprep.subr.bf16.mxu0 %v3542_v45  ;;  %2318 = vmatpush3.bf16.msra.mxu1 %v3420_v7  ;;  %v3555_v7 = vld [vmem:[#allocation17_spill] sm:$0xff] }
 0x7bd   :  { %2319 = vmatprep.subr.bf16.mxu1 %v3542_v45 }
 0x7bf   :  { %2300 = vmatpush3.bf16.msra.mxu0 %v3322_v37 }
 0x7c0   :  { %2320 = vmatpush3.bf16.msra.mxu1 %v3426_v8 }
 0x7c2   :  { %2302 = vmatmul.mubr.bf16.vlgmr.msra.gmra.mrb[60].mxu0 %v1562_v1 }
 0x875   :  { %v1597_v50 = vpop.f32.mrb[56].mxu0  ;;  %v1645_v23 = vpop.f32.mrb[48].mxu1 }
 0x876   :  { %v1598_v33 = vadd.f32 %v2494_v9, %v1597_v50  ;;  %v1652_v35 = vadd.f32 %v1645_v23, %v3554_v34  ;;  %v2283_v36 = vpop.f32.mrb[57].mxu0  ;;  %v1647_v54 = vpop.f32.mrb[49].mxu1 }
 0x877   :  { %v1659_v43 = vadd.f32 %v1647_v54, %v2934_v60  ;;  %v1600_v52 = vpop.f32.mrb[58].mxu0  ;;  %v1649_v45 = vpop.f32.mrb[50].mxu1 }
 0x878   :  { %1842 = vst [vmem:[%s3524_s8 + $0x30] sm:$0xff] %v1598_v33  ;;  %v1843_v37 = vmul.f32 -1.442695, %v1652_v35  ;;  %v2284_v57 = vpop.f32.mrb[59].mxu0  ;;  %v1650_v58 = vpop.f32.mrb[51].mxu1 }
 0x879   :  { %v1844_v47 = vmul.f32 -1.442695, %v1659_v43 }
 0x87a   :  { %2451 = vpow2.f32 %v1843_v37 }
 0x87b   :  { %2453 = vpow2.f32 %v1844_v47 }
 0x884   :  { %v2452_v59 = vpop.eup %2451 }
 0x885   :  { %v1656_v48 = vadd.f32 1.0, %v2452_v59  ;;  %v2454_v42 = vpop.eup %2453 }
 0x886   :  { %v1663_v46 = vadd.f32 1.0, %v2454_v42 }
 0x887   :  { %2455 = vrcp.f32 %v1656_v48 }
 0x888   :  { %2457 = vrcp.f32 %v1663_v46 }
 0x891   :  { %v2456_v53 = vpop.eup %2455 }
 0x892   :  { %v2458_v56 = vpop.eup %2457 }
 0x893   :  { %v1709_v17 = vsub.f32 1.0, %v2458_v56  ;;  %v1711_v26 = vmul.f32 %v2458_v56, %v3461_v14 }
 0x895   :  { %v1700_v62 = vpop.f32.mrb[60].mxu0 }
 0x896   :  { %v1701_v60 = vadd.f32 %v3456_v13, %v1700_v62  ;;  %v2303_v49 = vpop.f32.mrb[61].mxu0 }
 0x897   :  { %v1703_v4 = vpop.f32.mrb[62].mxu0 }
 0x898   :  { %v1706_v5 = vmul.f32 %v2456_v53, %v1701_v60  ;;  %v2304_v6 = vpop.f32.mrb[63].mxu0 }
 0x89a   :  { %v1707_v8 = vadd.f32 %v1706_v5, %v3555_v7 }
 0x89c   :  { %2459 = vtanh.f32 %v1707_v8 }
 0x8a6   :  { %v2460_v18 = vpop.eup %2459 }
 0x8a7   :  { %v1710_v22 = vmul.f32 %v2460_v18, %v1709_v17 }
 0x8a9   :  { %v1712_v28 = vadd.f32 %v1711_v26, %v1710_v22 }
 0x8ab   :  { %v1713_v30 = vpack.c.bf16 %v1712_v28, %v1712_v28  ;;  %1756 = vst [vmem:[%s3525_s9] sm:$0xff] %v1712_v28 }
 0x8ad   :  { %2322 = vmatmul.mubr.bf16.vlgmr.msra.gmra.mrb[52].mxu1 %v1713_v30 }
 0x980   :  { %v1748_v31 = vpop.f32.mrb[52].mxu1 }
 0x981   :  { %v1749_v32 = vadd.f32 %v2494_v9, %v1748_v31  ;;  %v2323_v55 = vpop.f32.mrb[53].mxu1 }
 0x982   :  { %v1751_v16 = vpop.f32.mrb[54].mxu1 }
 0x983   :  { %1845 = vst [vmem:[%s3524_s8 + $0x38] sm:$0xff] %v1749_v32  ;;  %v2324_v51 = vpop.f32.mrb[55].mxu1 }
 0x984   :  { %1765 = vsyncpa [#allocation4], 1 }
 0x985   :  { %1766 = vsyncpa [#allocation6], 1 }

</bundles_post_ra>
